<compile_context>
chip_gen: v5e
topology: v5e:2x2
jax: 0.10.0
libtpu: 0.0.40
codegen_flags: <defaults>
</compile_context>

<pallas_src>
import functools

import jax
import jax.numpy as jnp
from jax.experimental import pallas as pl
from jax.experimental.pallas import tpu as pltpu

EPS = 1e-12


# ---------------------------------------------------------------------------
# Fused kernel: power iteration + sigma + conv (sum over taps fused into one
# MXU matmul per sample) + bias.
# ---------------------------------------------------------------------------
def _spectral_norm_conv_kernel(w_pi_ref, w_cv_ref, u_ref, b_ref, x_ref,
                               y_ref, u_out_ref, v_out_ref, *,
                               H, W, KH, KW, power_iterations):
    """Refs:
      w_pi_ref : (Cout, K) f32   -- w_bar.view(Cout,-1), torch column order
                                    (cin-outer), used by the power iteration
      w_cv_ref : (Cout, K) bf16  -- tap-outer column order (t*Cin + cin),
                                    pre-cast in the wrapper for the conv MXU
      u_ref    : (1, Cout) f32
      b_ref    : (Cout, 1) f32
      x_ref    : (N, Cin, H*W) f32
      y_ref    : (N, Cout, H*W) f32
      u_out_ref: (1, Cout) f32, v_out_ref: (1, K) f32
    """
    HW = H * W
    ph, pw = KH // 2, KW // 2
    off = ph * W + pw                 # flat-spatial halo that covers all taps
    N, Cin = x_ref.shape[0], x_ref.shape[1]

    # ---- power iteration + sigma (runs once; (Cout,K)=(8,36) is tiny) -------
    # Row-vector layouts throughout -> no in-kernel transposes.
    contract_last = (((1,), (1,)), ((), ()))          # contract last dim of both
    w = w_pi_ref[...]                                 # (Cout, K) f32
    u = u_ref[...]                                    # (1, Cout)
    v = None
    for _ in range(power_iterations):
        v = jnp.dot(u, w, preferred_element_type=jnp.float32)          # (1, K)
        v = v / (jnp.sqrt(jnp.sum(v * v)) + EPS)
        wv = jax.lax.dot_general(v, w, contract_last,
                                 preferred_element_type=jnp.float32)   # (1, Cout)
        u = wv / (jnp.sqrt(jnp.sum(wv * wv)) + EPS)
    wv = jax.lax.dot_general(v, w, contract_last,
                             preferred_element_type=jnp.float32)       # (1, Cout)
    sigma = jnp.sum(u * wv)
    inv_sigma = 1.0 / sigma           # exact division, runs once (not per tile)
    u_out_ref[...] = u
    v_out_ref[...] = v

    # ---- border masks: only the 2 distinct left/right masks are needed ------
    # (top/bottom spill is handled by the zero halo below); hoisted out of the
    # tap AND sample loops.
    w_idx = jax.lax.broadcasted_iota(jnp.int32, (1, HW), 1) % W
    mask_w = {dw: jnp.logical_and(w_idx + dw >= 0, w_idx + dw < W)
              for dw in range(-pw, KW - pw) if dw != 0}

    w_cv = w_cv_ref[...]              # (Cout, K) bf16, tap-outer columns
    bias = b_ref[...]                 # (Cout, 1) f32

    zeros_halo = jnp.zeros((Cin, off), jnp.bfloat16) if off > 0 else None

    # N folded into a single grid step (static loop; N is tiny here).
    for n in range(N):
        # One bf16 cast per sample (was 9 per-tap casts of the same data).
        xb = x_ref[n].astype(jnp.bfloat16)                       # (Cin, HW)
        # Zero halo built in VMEM (no separate jnp.pad HBM pass).
        if off > 0:
            x_halo = jnp.concatenate([zeros_halo, xb, zeros_halo], axis=1)
        else:
            x_halo = xb                                          # (Cin, HW+2*off)

        # Stack the KH*KW shifted/masked windows along sublanes -> (K, HW),
        # row order t*Cin + cin matching w_cv's columns.
        parts = []
        for kh in range(KH):
            for kw in range(KW):
                d = (kh - ph) * W + (kw - pw)                    # flat shift
                win = x_halo[:, off + d: off + d + HW]           # (Cin, HW)
                dw = kw - pw
                if dw != 0:                                      # reuse 2 masks
                    win = jnp.where(mask_w[dw], win, jnp.zeros_like(win))
                parts.append(win)
        stacked = jnp.concatenate(parts, axis=0)                 # (K, HW) bf16

        # ONE fused MXU matmul per sample (was 9 tiny ones), f32 accumulate.
        acc = jnp.dot(w_cv, stacked, preferred_element_type=jnp.float32)
        # Spectral-norm scale + bias in the f32 epilogue (free under MXU slack).
        y_ref[n] = acc * inv_sigma + bias                        # (Cout, HW)


# ---------------------------------------------------------------------------
# Wrapper
# ---------------------------------------------------------------------------
def spectral_norm_conv2d(x, w_bar, bias, u, v, *, power_iterations=1):
    """SpectralNorm(nn.Conv2d(Cin, Cout, K, padding='same')).forward(x).

    x: (N, Cin, H, W) f32; w_bar: (Cout, Cin, KH, KW); bias: (Cout,);
    u: (Cout,); v: (Cin*KH*KW,) (unused by forward, as in torch).
    Returns (y, u_new, v_new) with y of shape (N, Cout, H, W).
    """
    if power_iterations < 1:
        raise ValueError("power_iterations must be >= 1")

    N, Cin, H, W = x.shape
    Cout, Cin_w, KH, KW = w_bar.shape
    assert Cin_w == Cin
    # Halo/mask scheme assumes stride 1, 'same' padding == (KH//2, KW//2),
    # odd kernel (per review correctness concern).
    assert KH % 2 == 1 and KW % 2 == 1, "only odd kernels with 'same' padding"
    K = Cin * KH * KW
    HW = H * W

    # Weight views (tiny, one-off XLA ops, independent of sigma):
    #   power-iteration view in torch order, f32;
    #   conv view with tap-outer columns, pre-cast bf16 for the MXU.
    w_pi = w_bar.reshape(Cout, K).astype(jnp.float32)
    w_cv = w_bar.transpose(0, 2, 3, 1).reshape(Cout, K).astype(jnp.bfloat16)
    u2 = u.reshape(1, Cout).astype(jnp.float32)
    b2 = bias.reshape(Cout, 1).astype(jnp.float32)
    # Pure reshape only -- no pad / extra HBM pass over the activation.
    x_flat = x.reshape(N, Cin, HW).astype(jnp.float32)

    kernel = functools.partial(_spectral_norm_conv_kernel,
                               H=H, W=W, KH=KH, KW=KW,
                               power_iterations=power_iterations)

    y_flat, u_new, v_new = pl.pallas_call(
        kernel,
        grid=(1,),                       # one fat step; see header for scaling
        in_specs=[
            pl.BlockSpec((Cout, K), lambda i: (0, 0)),         # w_pi (f32)
            pl.BlockSpec((Cout, K), lambda i: (0, 0)),         # w_cv (bf16)
            pl.BlockSpec((1, Cout), lambda i: (0, 0)),         # u
            pl.BlockSpec((Cout, 1), lambda i: (0, 0)),         # bias
            pl.BlockSpec((N, Cin, HW), lambda i: (0, 0, 0)),   # activations
        ],
        out_specs=[
            pl.BlockSpec((N, Cout, HW), lambda i: (0, 0, 0)),
            pl.BlockSpec((1, Cout), lambda i: (0, 0)),
            pl.BlockSpec((1, K), lambda i: (0, 0)),
        ],
        out_shape=[
            jax.ShapeDtypeStruct((N, Cout, HW), jnp.float32),
            jax.ShapeDtypeStruct((1, Cout), jnp.float32),
            jax.ShapeDtypeStruct((1, K), jnp.float32),
        ],
        compiler_params=pltpu.CompilerParams(
            # Single step -> semantics irrelevant; everything fits easily in the
            # default scoped VMEM on all of v5e/v6e/v7x at these shapes.
            dimension_semantics=("arbitrary",),
        ),
    )(w_pi, w_cv, u2, b2, x_flat)

    y = y_flat.reshape(N, Cout, H, W)    # pure reshape -- already NCHW
    return y, u_new.reshape(Cout), v_new.reshape(K)


# ---------------------------------------------------------------------------
# Pure-JAX reference mirroring PyTorch SpectralNorm._update_u_v + conv.
# ---------------------------------------------------------------------------
def _reference_forward(x, w_bar, bias, u, v, power_iterations=1):
    Cout = w_bar.shape[0]
    w_mat = w_bar.reshape(Cout, -1)
    for _ in range(power_iterations):
        v = w_mat.T @ u
        v = v / (jnp.linalg.norm(v) + EPS)
        u = w_mat @ v
        u = u / (jnp.linalg.norm(u) + EPS)
    sigma = u @ (w_mat @ v)
    w_sn = w_bar / sigma
    y = jax.lax.conv_general_dilated(
        x, w_sn, window_strides=(1, 1), padding="SAME",
        dimension_numbers=("NCHW", "OIHW", "NCHW"),
        precision=jax.lax.Precision.HIGHEST)
    return y + bias[None, :, None, None], u, v


if __name__ == "__main__":
    key = jax.random.PRNGKey(0)
    k_x, k_w, k_b, k_u, k_v = jax.random.split(key, 5)

    N, Cin, H, W = 2, 4, 16, 16
    Cout, KH, KW = 8, 3, 3
    K = Cin * KH * KW

    x = jax.random.normal(k_x, (N, Cin, H, W), dtype=jnp.float32)

    # Deterministic init, shapes matching SpectralNorm(nn.Conv2d(4, 8, 3,
    # padding=1)) params/buffers.
    fan_in = Cin * KH * KW
    bound = 1.0 / jnp.sqrt(fan_in)
    w_bar = jax.random.uniform(k_w, (Cout, Cin, KH, KW), jnp.float32, -bound, bound)
    bias = jax.random.uniform(k_b, (Cout,), jnp.float32, -bound, bound)
    u0 = jax.random.normal(k_u, (Cout,), jnp.float32)
    v0 = jax.random.normal(k_v, (K,), jnp.float32)
    u0 = u0 / (jnp.linalg.norm(u0) + EPS)
    v0 = v0 / (jnp.linalg.norm(v0) + EPS)

    y, u_new, v_new = spectral_norm_conv2d(x, w_bar, bias, u0, v0,
                                           power_iterations=1)
    jax.block_until_ready((y, u_new, v_new))

    y_ref, u_ref, v_ref = _reference_forward(x, w_bar, bias, u0, v0, 1)
    assert y.shape == (N, Cout, H, W)
    # Conv uses bf16 MXU operands with f32 accumulation -> looser tolerance.
    assert jnp.allclose(y, y_ref, rtol=3e-2, atol=3e-2), \
        float(jnp.max(jnp.abs(y - y_ref)))
    assert jnp.allclose(u_new, u_ref, rtol=1e-4, atol=1e-4)
    assert jnp.allclose(v_new, v_ref, rtol=1e-4, atol=1e-4)

    print("KERNEL_OK")
</pallas_src>

<mosaic_0001>
module attributes {stable_mosaic.version = 11 : i64} {
  func.func @_spectral_norm_conv_kernel(%arg0: i32, %arg1: memref<8x36xf32, #tpu.memory_space<vmem>>, %arg2: memref<8x36xbf16, #tpu.memory_space<vmem>>, %arg3: memref<1x8xf32, #tpu.memory_space<vmem>>, %arg4: memref<8x1xf32, #tpu.memory_space<vmem>>, %arg5: memref<2x4x256xf32, #tpu.memory_space<vmem>>, %arg6: memref<2x8x256xf32, #tpu.memory_space<vmem>>, %arg7: memref<1x8xf32, #tpu.memory_space<vmem>>, %arg8: memref<1x36xf32, #tpu.memory_space<vmem>>) attributes {dimension_semantics = [#tpu.dimension_semantics<arbitrary>], iteration_bounds = array<i64: 1>, scalar_prefetch = 0 : i64, scratch_operands = 0 : i64, tpu.core_type = #tpu.core_type<tc>, window_params = [{pipeline_mode = #tpu.pipeline_mode<synchronous>, transform_indices = @transform_0, window_bounds = array<i64: 8, 36>}, {pipeline_mode = #tpu.pipeline_mode<synchronous>, transform_indices = @transform_1, window_bounds = array<i64: 8, 36>}, {pipeline_mode = #tpu.pipeline_mode<synchronous>, transform_indices = @transform_2, window_bounds = array<i64: 1, 8>}, {pipeline_mode = #tpu.pipeline_mode<synchronous>, transform_indices = @transform_3, window_bounds = array<i64: 8, 1>}, {pipeline_mode = #tpu.pipeline_mode<synchronous>, transform_indices = @transform_4, window_bounds = array<i64: 2, 4, 256>}, {pipeline_mode = #tpu.pipeline_mode<synchronous>, transform_indices = @transform_5, window_bounds = array<i64: 2, 8, 256>}, {pipeline_mode = #tpu.pipeline_mode<synchronous>, transform_indices = @transform_6, window_bounds = array<i64: 1, 8>}, {pipeline_mode = #tpu.pipeline_mode<synchronous>, transform_indices = @transform_7, window_bounds = array<i64: 1, 36>}]} {
    %c0 = arith.constant 0 : index
    %c0_0 = arith.constant 0 : index
    %0 = vector.load %arg1[%c0, %c0_0] : memref<8x36xf32, #tpu.memory_space<vmem>>, vector<8x36xf32>
    %c0_1 = arith.constant 0 : index
    %c0_2 = arith.constant 0 : index
    %1 = vector.load %arg3[%c0_1, %c0_2] : memref<1x8xf32, #tpu.memory_space<vmem>>, vector<1x8xf32>
    %cst = arith.constant dense<0.000000e+00> : vector<1x36xf32>
    %2 = tpu.matmul %1, %0, %cst {dimension_numbers = #tpu.dot_dimension_numbers<[1], [0], [0], [1], [0, 0, 1, 1], [], []>} : vector<1x8xf32>, vector<8x36xf32>, vector<1x36xf32> -> vector<1x36xf32>
    %3 = arith.mulf %2, %2 : vector<1x36xf32>
    %4 = vector.shape_cast %3 : vector<1x36xf32> to vector<1x1x36xf32>
    %cst_3 = arith.constant dense<0.000000e+00> : vector<1xf32>
    %5 = vector.multi_reduction <add>, %4, %cst_3 [1, 2] : vector<1x1x36xf32> to vector<1xf32>
    %6 = vector.shape_cast %5 : vector<1xf32> to vector<1x1x1xf32>
    %7 = vector.extract %6[0, 0, 0] : f32 from vector<1x1x1xf32>
    %8 = math.sqrt %7 : f32
    %cst_4 = arith.constant 9.99999996E-13 : f32
    %9 = arith.addf %8, %cst_4 : f32
    %10 = vector.broadcast %9 : f32 to vector<1x36xf32>
    %11 = arith.divf %2, %10 : vector<1x36xf32>
    %cst_5 = arith.constant dense<0.000000e+00> : vector<1x8xf32>
    %12 = tpu.matmul %11, %0, %cst_5 {dimension_numbers = #tpu.dot_dimension_numbers<[1], [1], [0], [0], [0, 0, 1, 0], [], []>} : vector<1x36xf32>, vector<8x36xf32>, vector<1x8xf32> -> vector<1x8xf32>
    %13 = arith.mulf %12, %12 : vector<1x8xf32>
    %14 = vector.shape_cast %13 : vector<1x8xf32> to vector<1x1x8xf32>
    %cst_6 = arith.constant dense<0.000000e+00> : vector<1xf32>
    %15 = vector.multi_reduction <add>, %14, %cst_6 [1, 2] : vector<1x1x8xf32> to vector<1xf32>
    %16 = vector.shape_cast %15 : vector<1xf32> to vector<1x1x1xf32>
    %17 = vector.extract %16[0, 0, 0] : f32 from vector<1x1x1xf32>
    %18 = math.sqrt %17 : f32
    %cst_7 = arith.constant 9.99999996E-13 : f32
    %19 = arith.addf %18, %cst_7 : f32
    %20 = vector.broadcast %19 : f32 to vector<1x8xf32>
    %21 = arith.divf %12, %20 : vector<1x8xf32>
    %cst_8 = arith.constant dense<0.000000e+00> : vector<1x8xf32>
    %22 = tpu.matmul %11, %0, %cst_8 {dimension_numbers = #tpu.dot_dimension_numbers<[1], [1], [0], [0], [0, 0, 1, 0], [], []>} : vector<1x36xf32>, vector<8x36xf32>, vector<1x8xf32> -> vector<1x8xf32>
    %23 = arith.mulf %21, %22 : vector<1x8xf32>
    %24 = vector.shape_cast %23 : vector<1x8xf32> to vector<1x1x8xf32>
    %cst_9 = arith.constant dense<0.000000e+00> : vector<1xf32>
    %25 = vector.multi_reduction <add>, %24, %cst_9 [1, 2] : vector<1x1x8xf32> to vector<1xf32>
    %26 = vector.shape_cast %25 : vector<1xf32> to vector<1x1x1xf32>
    %27 = vector.extract %26[0, 0, 0] : f32 from vector<1x1x1xf32>
    %cst_10 = arith.constant 1.000000e+00 : f32
    %28 = arith.divf %cst_10, %27 : f32
    %c0_11 = arith.constant 0 : index
    %c0_12 = arith.constant 0 : index
    %29 = vector.load %arg7[%c0_11, %c0_12] : memref<1x8xf32, #tpu.memory_space<vmem>>, vector<1x8xf32>
    tpu.vector_store %arg7[%c0_11, %c0_12], %21 {strides = array<i32>} : memref<1x8xf32, #tpu.memory_space<vmem>>, vector<1x8xf32>,
    %c0_13 = arith.constant 0 : index
    %c0_14 = arith.constant 0 : index
    %30 = vector.load %arg8[%c0_13, %c0_14] : memref<1x36xf32, #tpu.memory_space<vmem>>, vector<1x36xf32>
    tpu.vector_store %arg8[%c0_13, %c0_14], %11 {strides = array<i32>} : memref<1x36xf32, #tpu.memory_space<vmem>>, vector<1x36xf32>,
    %31 = tpu.iota {dimensions = array<i32: 1>} : vector<1x256xi32>
    %c16_i32 = arith.constant 16 : i32
    %c0_i32 = arith.constant 0 : i32
    %32 = arith.cmpi eq, %c16_i32, %c0_i32 : i32
    %c1_i32 = arith.constant 1 : i32
    %33 = arith.select %32, %c1_i32, %c16_i32 : i32
    %34 = vector.broadcast %33 : i32 to vector<1x256xi32>
    %35 = arith.remsi %31, %34 : vector<1x256xi32>
    %c0_i32_15 = arith.constant 0 : i32
    %36 = vector.broadcast %c0_i32_15 : i32 to vector<1x256xi32>
    %37 = arith.cmpi ne, %35, %36 : vector<1x256xi32>
    %c0_i32_16 = arith.constant 0 : i32
    %38 = vector.broadcast %c0_i32_16 : i32 to vector<1x256xi32>
    %39 = arith.cmpi slt, %35, %38 : vector<1x256xi32>
    %c0_i32_17 = arith.constant 0 : i32
    %40 = arith.cmpi slt, %33, %c0_i32_17 : i32
    %41 = vector.broadcast %40 : i1 to vector<1x256xi1>
    %42 = vector.broadcast %41 : vector<1x256xi1> to vector<1x256xi1>
    %43 = arith.xori %39, %42 : vector<1x256xi1>
    %44 = arith.andi %43, %37 : vector<1x256xi1>
    %45 = vector.broadcast %33 : i32 to vector<1x256xi32>
    %46 = arith.addi %35, %45 : vector<1x256xi32>
    %47 = arith.select %44, %46, %35 : vector<1x256xi1>, vector<1x256xi32>
    %c-1_i32 = arith.constant -1 : i32
    %48 = vector.broadcast %c-1_i32 : i32 to vector<1x256xi32>
    %49 = arith.addi %47, %48 : vector<1x256xi32>
    %c0_i32_18 = arith.constant 0 : i32
    %50 = vector.broadcast %c0_i32_18 : i32 to vector<1x256xi32>
    %51 = arith.cmpi sge, %49, %50 : vector<1x256xi32>
    %c-1_i32_19 = arith.constant -1 : i32
    %52 = vector.broadcast %c-1_i32_19 : i32 to vector<1x256xi32>
    %53 = arith.addi %47, %52 : vector<1x256xi32>
    %c16_i32_20 = arith.constant 16 : i32
    %54 = vector.broadcast %c16_i32_20 : i32 to vector<1x256xi32>
    %55 = arith.cmpi slt, %53, %54 : vector<1x256xi32>
    %56 = arith.andi %51, %55 : vector<1x256xi1>
    %c1_i32_21 = arith.constant 1 : i32
    %57 = vector.broadcast %c1_i32_21 : i32 to vector<1x256xi32>
    %58 = arith.addi %47, %57 : vector<1x256xi32>
    %c0_i32_22 = arith.constant 0 : i32
    %59 = vector.broadcast %c0_i32_22 : i32 to vector<1x256xi32>
    %60 = arith.cmpi sge, %58, %59 : vector<1x256xi32>
    %c1_i32_23 = arith.constant 1 : i32
    %61 = vector.broadcast %c1_i32_23 : i32 to vector<1x256xi32>
    %62 = arith.addi %47, %61 : vector<1x256xi32>
    %c16_i32_24 = arith.constant 16 : i32
    %63 = vector.broadcast %c16_i32_24 : i32 to vector<1x256xi32>
    %64 = arith.cmpi slt, %62, %63 : vector<1x256xi32>
    %65 = arith.andi %60, %64 : vector<1x256xi1>
    %c0_25 = arith.constant 0 : index
    %c0_26 = arith.constant 0 : index
    %66 = vector.load %arg2[%c0_25, %c0_26] : memref<8x36xbf16, #tpu.memory_space<vmem>>, vector<8x36xbf16>
    %c0_27 = arith.constant 0 : index
    %c0_28 = arith.constant 0 : index
    %67 = vector.load %arg4[%c0_27, %c0_28] : memref<8x1xf32, #tpu.memory_space<vmem>>, vector<8x1xf32>
    %cst_29 = arith.constant 0.000000e+00 : bf16
    %68 = vector.broadcast %cst_29 : bf16 to vector<4x17xbf16>
    %c0_30 = arith.constant 0 : index
    %c0_31 = arith.constant 0 : index
    %c0_32 = arith.constant 0 : index
    %69 = vector.load %arg5[%c0_30, %c0_31, %c0_32] : memref<2x4x256xf32, #tpu.memory_space<vmem>>, vector<1x4x256xf32>
    %70 = vector.shape_cast %69 : vector<1x4x256xf32> to vector<4x256xf32>
    %71 = arith.truncf %70 : vector<4x256xf32> to vector<4x256xbf16>
    %72 = tpu.concatenate %68, %71, %68 in 1 : vector<4x17xbf16>, vector<4x256xbf16>, vector<4x17xbf16> -> vector<4x290xbf16>
    %73 = vector.extract_strided_slice %72 {offsets = [0, 0], sizes = [4, 256], strides = [1, 1]} : vector<4x290xbf16> to vector<4x256xbf16>
    %cst_33 = arith.constant 0.000000e+00 : bf16
    %74 = vector.broadcast %cst_33 : bf16 to vector<4x256xbf16>
    %75 = vector.shape_cast %56 : vector<1x256xi1> to vector<1x256xi1>
    %76 = vector.broadcast %75 : vector<1x256xi1> to vector<4x256xi1>
    %77 = arith.select %76, %73, %74 : vector<4x256xi1>, vector<4x256xbf16>
    %78 = vector.extract_strided_slice %72 {offsets = [0, 1], sizes = [4, 256], strides = [1, 1]} : vector<4x290xbf16> to vector<4x256xbf16>
    %79 = vector.extract_strided_slice %72 {offsets = [0, 2], sizes = [4, 256], strides = [1, 1]} : vector<4x290xbf16> to vector<4x256xbf16>
    %cst_34 = arith.constant 0.000000e+00 : bf16
    %80 = vector.broadcast %cst_34 : bf16 to vector<4x256xbf16>
    %81 = vector.shape_cast %65 : vector<1x256xi1> to vector<1x256xi1>
    %82 = vector.broadcast %81 : vector<1x256xi1> to vector<4x256xi1>
    %83 = arith.select %82, %79, %80 : vector<4x256xi1>, vector<4x256xbf16>
    %84 = vector.extract_strided_slice %72 {offsets = [0, 16], sizes = [4, 256], strides = [1, 1]} : vector<4x290xbf16> to vector<4x256xbf16>
    %cst_35 = arith.constant 0.000000e+00 : bf16
    %85 = vector.broadcast %cst_35 : bf16 to vector<4x256xbf16>
    %86 = vector.shape_cast %56 : vector<1x256xi1> to vector<1x256xi1>
    %87 = vector.broadcast %86 : vector<1x256xi1> to vector<4x256xi1>
    %88 = arith.select %87, %84, %85 : vector<4x256xi1>, vector<4x256xbf16>
    %89 = vector.extract_strided_slice %72 {offsets = [0, 17], sizes = [4, 256], strides = [1, 1]} : vector<4x290xbf16> to vector<4x256xbf16>
    %90 = vector.extract_strided_slice %72 {offsets = [0, 18], sizes = [4, 256], strides = [1, 1]} : vector<4x290xbf16> to vector<4x256xbf16>
    %cst_36 = arith.constant 0.000000e+00 : bf16
    %91 = vector.broadcast %cst_36 : bf16 to vector<4x256xbf16>
    %92 = vector.shape_cast %65 : vector<1x256xi1> to vector<1x256xi1>
    %93 = vector.broadcast %92 : vector<1x256xi1> to vector<4x256xi1>
    %94 = arith.select %93, %90, %91 : vector<4x256xi1>, vector<4x256xbf16>
    %95 = vector.extract_strided_slice %72 {offsets = [0, 32], sizes = [4, 256], strides = [1, 1]} : vector<4x290xbf16> to vector<4x256xbf16>
    %cst_37 = arith.constant 0.000000e+00 : bf16
    %96 = vector.broadcast %cst_37 : bf16 to vector<4x256xbf16>
    %97 = vector.shape_cast %56 : vector<1x256xi1> to vector<1x256xi1>
    %98 = vector.broadcast %97 : vector<1x256xi1> to vector<4x256xi1>
    %99 = arith.select %98, %95, %96 : vector<4x256xi1>, vector<4x256xbf16>
    %100 = vector.extract_strided_slice %72 {offsets = [0, 33], sizes = [4, 256], strides = [1, 1]} : vector<4x290xbf16> to vector<4x256xbf16>
    %101 = vector.extract_strided_slice %72 {offsets = [0, 34], sizes = [4, 256], strides = [1, 1]} : vector<4x290xbf16> to vector<4x256xbf16>
    %cst_38 = arith.constant 0.000000e+00 : bf16
    %102 = vector.broadcast %cst_38 : bf16 to vector<4x256xbf16>
    %103 = vector.shape_cast %65 : vector<1x256xi1> to vector<1x256xi1>
    %104 = vector.broadcast %103 : vector<1x256xi1> to vector<4x256xi1>
    %105 = arith.select %104, %101, %102 : vector<4x256xi1>, vector<4x256xbf16>
    %106 = tpu.concatenate %77, %78, %83, %88, %89, %94, %99, %100, %105 in 0 : vector<4x256xbf16>, vector<4x256xbf16>, vector<4x256xbf16>, vector<4x256xbf16>, vector<4x256xbf16>, vector<4x256xbf16>, vector<4x256xbf16>, vector<4x256xbf16>, vector<4x256xbf16> -> vector<36x256xbf16>
    %cst_39 = arith.constant dense<0.000000e+00> : vector<8x256xf32>
    %107 = tpu.matmul %66, %106, %cst_39 {dimension_numbers = #tpu.dot_dimension_numbers<[1], [0], [0], [1], [0, 0, 1, 1], [], []>} : vector<8x36xbf16>, vector<36x256xbf16>, vector<8x256xf32> -> vector<8x256xf32>
    %108 = vector.broadcast %28 : f32 to vector<8x256xf32>
    %109 = arith.mulf %107, %108 : vector<8x256xf32>
    %110 = vector.broadcast %67 : vector<8x1xf32> to vector<8x256xf32>
    %111 = arith.addf %109, %110 : vector<8x256xf32>
    %c0_40 = arith.constant 0 : index
    %c0_41 = arith.constant 0 : index
    %c0_42 = arith.constant 0 : index
    %112 = vector.load %arg6[%c0_40, %c0_41, %c0_42] : memref<2x8x256xf32, #tpu.memory_space<vmem>>, vector<1x8x256xf32>
    %113 = vector.shape_cast %112 : vector<1x8x256xf32> to vector<8x256xf32>
    %114 = vector.shape_cast %111 : vector<8x256xf32> to vector<1x8x256xf32>
    tpu.vector_store %arg6[%c0_40, %c0_41, %c0_42], %114 {strides = array<i32>} : memref<2x8x256xf32, #tpu.memory_space<vmem>>, vector<1x8x256xf32>,
    %c1 = arith.constant 1 : index
    %c0_43 = arith.constant 0 : index
    %c0_44 = arith.constant 0 : index
    %115 = vector.load %arg5[%c1, %c0_43, %c0_44] : memref<2x4x256xf32, #tpu.memory_space<vmem>>, vector<1x4x256xf32>
    %116 = vector.shape_cast %115 : vector<1x4x256xf32> to vector<4x256xf32>
    %117 = arith.truncf %116 : vector<4x256xf32> to vector<4x256xbf16>
    %118 = tpu.concatenate %68, %117, %68 in 1 : vector<4x17xbf16>, vector<4x256xbf16>, vector<4x17xbf16> -> vector<4x290xbf16>
    %119 = vector.extract_strided_slice %118 {offsets = [0, 0], sizes = [4, 256], strides = [1, 1]} : vector<4x290xbf16> to vector<4x256xbf16>
    %cst_45 = arith.constant 0.000000e+00 : bf16
    %120 = vector.broadcast %cst_45 : bf16 to vector<4x256xbf16>
    %121 = vector.shape_cast %56 : vector<1x256xi1> to vector<1x256xi1>
    %122 = vector.broadcast %121 : vector<1x256xi1> to vector<4x256xi1>
    %123 = arith.select %122, %119, %120 : vector<4x256xi1>, vector<4x256xbf16>
    %124 = vector.extract_strided_slice %118 {offsets = [0, 1], sizes = [4, 256], strides = [1, 1]} : vector<4x290xbf16> to vector<4x256xbf16>
    %125 = vector.extract_strided_slice %118 {offsets = [0, 2], sizes = [4, 256], strides = [1, 1]} : vector<4x290xbf16> to vector<4x256xbf16>
    %cst_46 = arith.constant 0.000000e+00 : bf16
    %126 = vector.broadcast %cst_46 : bf16 to vector<4x256xbf16>
    %127 = vector.shape_cast %65 : vector<1x256xi1> to vector<1x256xi1>
    %128 = vector.broadcast %127 : vector<1x256xi1> to vector<4x256xi1>
    %129 = arith.select %128, %125, %126 : vector<4x256xi1>, vector<4x256xbf16>
    %130 = vector.extract_strided_slice %118 {offsets = [0, 16], sizes = [4, 256], strides = [1, 1]} : vector<4x290xbf16> to vector<4x256xbf16>
    %cst_47 = arith.constant 0.000000e+00 : bf16
    %131 = vector.broadcast %cst_47 : bf16 to vector<4x256xbf16>
    %132 = vector.shape_cast %56 : vector<1x256xi1> to vector<1x256xi1>
    %133 = vector.broadcast %132 : vector<1x256xi1> to vector<4x256xi1>
    %134 = arith.select %133, %130, %131 : vector<4x256xi1>, vector<4x256xbf16>
    %135 = vector.extract_strided_slice %118 {offsets = [0, 17], sizes = [4, 256], strides = [1, 1]} : vector<4x290xbf16> to vector<4x256xbf16>
    %136 = vector.extract_strided_slice %118 {offsets = [0, 18], sizes = [4, 256], strides = [1, 1]} : vector<4x290xbf16> to vector<4x256xbf16>
    %cst_48 = arith.constant 0.000000e+00 : bf16
    %137 = vector.broadcast %cst_48 : bf16 to vector<4x256xbf16>
    %138 = vector.shape_cast %65 : vector<1x256xi1> to vector<1x256xi1>
    %139 = vector.broadcast %138 : vector<1x256xi1> to vector<4x256xi1>
    %140 = arith.select %139, %136, %137 : vector<4x256xi1>, vector<4x256xbf16>
    %141 = vector.extract_strided_slice %118 {offsets = [0, 32], sizes = [4, 256], strides = [1, 1]} : vector<4x290xbf16> to vector<4x256xbf16>
    %cst_49 = arith.constant 0.000000e+00 : bf16
    %142 = vector.broadcast %cst_49 : bf16 to vector<4x256xbf16>
    %143 = vector.shape_cast %56 : vector<1x256xi1> to vector<1x256xi1>
    %144 = vector.broadcast %143 : vector<1x256xi1> to vector<4x256xi1>
    %145 = arith.select %144, %141, %142 : vector<4x256xi1>, vector<4x256xbf16>
    %146 = vector.extract_strided_slice %118 {offsets = [0, 33], sizes = [4, 256], strides = [1, 1]} : vector<4x290xbf16> to vector<4x256xbf16>
    %147 = vector.extract_strided_slice %118 {offsets = [0, 34], sizes = [4, 256], strides = [1, 1]} : vector<4x290xbf16> to vector<4x256xbf16>
    %cst_50 = arith.constant 0.000000e+00 : bf16
    %148 = vector.broadcast %cst_50 : bf16 to vector<4x256xbf16>
    %149 = vector.shape_cast %65 : vector<1x256xi1> to vector<1x256xi1>
    %150 = vector.broadcast %149 : vector<1x256xi1> to vector<4x256xi1>
    %151 = arith.select %150, %147, %148 : vector<4x256xi1>, vector<4x256xbf16>
    %152 = tpu.concatenate %123, %124, %129, %134, %135, %140, %145, %146, %151 in 0 : vector<4x256xbf16>, vector<4x256xbf16>, vector<4x256xbf16>, vector<4x256xbf16>, vector<4x256xbf16>, vector<4x256xbf16>, vector<4x256xbf16>, vector<4x256xbf16>, vector<4x256xbf16> -> vector<36x256xbf16>
    %cst_51 = arith.constant dense<0.000000e+00> : vector<8x256xf32>
    %153 = tpu.matmul %66, %152, %cst_51 {dimension_numbers = #tpu.dot_dimension_numbers<[1], [0], [0], [1], [0, 0, 1, 1], [], []>} : vector<8x36xbf16>, vector<36x256xbf16>, vector<8x256xf32> -> vector<8x256xf32>
    %154 = vector.broadcast %28 : f32 to vector<8x256xf32>
    %155 = arith.mulf %153, %154 : vector<8x256xf32>
    %156 = vector.broadcast %67 : vector<8x1xf32> to vector<8x256xf32>
    %157 = arith.addf %155, %156 : vector<8x256xf32>
    %c1_52 = arith.constant 1 : index
    %c0_53 = arith.constant 0 : index
    %c0_54 = arith.constant 0 : index
    %158 = vector.load %arg6[%c1_52, %c0_53, %c0_54] : memref<2x8x256xf32, #tpu.memory_space<vmem>>, vector<1x8x256xf32>
    %159 = vector.shape_cast %158 : vector<1x8x256xf32> to vector<8x256xf32>
    %160 = vector.shape_cast %157 : vector<8x256xf32> to vector<1x8x256xf32>
    tpu.vector_store %arg6[%c1_52, %c0_53, %c0_54], %160 {strides = array<i32>} : memref<2x8x256xf32, #tpu.memory_space<vmem>>, vector<1x8x256xf32>,
    return
  }
  func.func @transform_0(%arg0: i32) -> (i32, i32) {
    %c0_i32 = arith.constant 0 : i32
    %c0_i32_0 = arith.constant 0 : i32
    %c0_i32_1 = arith.constant 0 : i32
    return %c0_i32, %c0_i32_0 : i32, i32
  }
  func.func @transform_1(%arg0: i32) -> (i32, i32) {
    %c0_i32 = arith.constant 0 : i32
    %c0_i32_0 = arith.constant 0 : i32
    %c0_i32_1 = arith.constant 0 : i32
    return %c0_i32, %c0_i32_0 : i32, i32
  }
  func.func @transform_2(%arg0: i32) -> (i32, i32) {
    %c0_i32 = arith.constant 0 : i32
    %c0_i32_0 = arith.constant 0 : i32
    %c0_i32_1 = arith.constant 0 : i32
    return %c0_i32, %c0_i32_0 : i32, i32
  }
  func.func @transform_3(%arg0: i32) -> (i32, i32) {
    %c0_i32 = arith.constant 0 : i32
    %c0_i32_0 = arith.constant 0 : i32
    %c0_i32_1 = arith.constant 0 : i32
    return %c0_i32, %c0_i32_0 : i32, i32
  }
  func.func @transform_4(%arg0: i32) -> (i32, i32, i32) {
    %c0_i32 = arith.constant 0 : i32
    %c0_i32_0 = arith.constant 0 : i32
    %c0_i32_1 = arith.constant 0 : i32
    %c0_i32_2 = arith.constant 0 : i32
    return %c0_i32, %c0_i32_0, %c0_i32_1 : i32, i32, i32
  }
  func.func @transform_5(%arg0: i32) -> (i32, i32, i32) {
    %c0_i32 = arith.constant 0 : i32
    %c0_i32_0 = arith.constant 0 : i32
    %c0_i32_1 = arith.constant 0 : i32
    %c0_i32_2 = arith.constant 0 : i32
    return %c0_i32, %c0_i32_0, %c0_i32_1 : i32, i32, i32
  }
  func.func @transform_6(%arg0: i32) -> (i32, i32) {
    %c0_i32 = arith.constant 0 : i32
    %c0_i32_0 = arith.constant 0 : i32
    %c0_i32_1 = arith.constant 0 : i32
    return %c0_i32, %c0_i32_0 : i32, i32
  }
  func.func @transform_7(%arg0: i32) -> (i32, i32) {
    %c0_i32 = arith.constant 0 : i32
    %c0_i32_0 = arith.constant 0 : i32
    %c0_i32_1 = arith.constant 0 : i32
    return %c0_i32, %c0_i32_0 : i32, i32
  }
}

</mosaic_0001>

<bundles_post_ra>
// kernel: tpu_custom_call.1
= control target key start
LH: loop header
LB: loop body
LE: loop exit
PB: predicated region body
PF: predicated region fallthrough
CT: control target
= control target key end

     0   :  { %13 = vsyncpa [#allocation3], 0  ;;  %s1869_s0 = inlined_call_operand.vmem [shape: f32[8,36], index: 0, kind: input, shape index: {}]   ;;  %s1870_s1 = inlined_call_operand.hbm [shape: bf16[8,36], index: 1, kind: input, shape index: {}]   ;;  %s1871_s2 = inlined_call_operand.vmem [shape: f32[1,8], index: 2, kind: input, shape index: {}]   ;;  %s1872_s3 = inlined_call_operand.vmem [shape: f32[8,1], index: 3, kind: input, shape index: {}]   ;;  %s1873_s4 = inlined_call_operand.hbm [shape: f32[2,4,256], index: 4, kind: input, shape index: {}]   ;;  %s1874_s5 = inlined_call_operand.hbm [shape: f32[2,8,256], index: 5, kind: output, shape index: {0}]   ;;  %s1875_s6 = inlined_call_operand.hbm [shape: f32[1,8], index: 6, kind: output, shape index: {1}]   ;;  %s1876_s7 = inlined_call_operand.hbm [shape: f32[1,36], index: 7, kind: output, shape index: {2}]  }
   0x1   :  { %14 = vsyncpa [#allocation6], 0 }
   0x2   :  { %15 = vsyncpa [#allocation4], 0 }
   0x3   :  { %16 = vsyncpa [#allocation9], 0  ;;  %s24_s26 = sshll.u32 %s1870_s1, 4  ;;  %s1116_s27 = smov [#allocation2]   ;;  %s25_s26 = int_to_ptr.hbm [resolvable:$true] %s24_s26 }
   0x4   :  { %s26_s28 = sshll.u32 %s1116_s27, 4  ;;  %s38_s8 = sshll.u32 %s1873_s4, 4  ;;  %s27_s28 = int_to_ptr.vmem [resolvable:$true] %s26_s28  ;;  %s39_s8 = int_to_ptr.hbm [resolvable:$true] %s38_s8 }
   0x5   :  { %29 = dma.hbm_to_vmem [thread:$0]  %s25_s26, 64, %s27_s28, [#allocation3]  }
   0x6   :  { %s1117_s9 = smov [#allocation5]   ;;  %s1118_s11 = smov 128  }
   0x7   :  { %s40_s10 = sshll.u32 %s1117_s9, 4  ;;  %s1119_s12 = smov 8   ;;  %s41_s10 = int_to_ptr.vmem [resolvable:$true] %s40_s10 }
   0x8   :  { %46 = dma.hbm_to_vmem [thread:$0]  %s39_s8, 256, %s41_s10, [#allocation6], %s1118_s11, %s1118_s11, %s1119_s12  }
   0x9   :  { %1108 = dma.done.wait [#allocation3], 64  }
   0xa   :  { %1109 = vsyncadd [#allocation3], 4294967232 }
   0xb   :  { %1110 = dma.done.wait [#allocation6], 256  }
   0xc   :  { %1111 = vsyncadd [#allocation6], 4294967040  ;;  %vm60_vm0 = vcmask 64512   ;;  %v58_v0 = vld [vmem:[%s1869_s0] sm:$0xff]  ;;  %vm85_vm1 = vcmask 286720   ;;  %vm1877_vm4 = vcmask 293888   ;;  %v226_v23 = vlaneseq }
   0xd   :  { %v59_v1 = vld [vmem:[%s1871_s2] sm:$0x1]  ;;  %79 = vmatpush.msra.mxu0 %v58_v0  ;;  %935 = vmatpush.xpose.msk.msra.mxu1 %vm1877_vm4, %v58_v0  ;;  %v271_v24 = vld [vmem:[#allocation5] sm:$0xff]  ;;  %v1120_v25 = vmov 0   ;;  %v671_v31 = vld [vmem:[#allocation5 + $0x8] sm:$0xff]  ;;  %s1121_s16 = smov 18  }
   0xe   :  { %934 = vmatmul.msk.f32.vlgmr.msra.gmra.mxu0 %vm60_vm0, %v59_v1  ;;  %273 = vst [vmem:[#allocation1] ss:$2 sm:$0xff] %v271_v24  ;;  %976 = vset.pattern.permute.xlu1 %v1120_v25  ;;  %v227_v26 = vand.u32 127, %v226_v23  ;;  %s1122_s17 = smov 34   ;;  %s1123_s18 = smov 32   ;;  %vm1878_vm15 = vcmask 57344  }
   0xf   :  { %977 = vset.pattern.permute.xlu0 %v1120_v25  ;;  %s1124_s19 = smov 17   ;;  %s1125_s20 = smov 2   ;;  %vm455_vm0 = vcmask 277504  }
  0x10   :  { %v228_v27 = vadd.s32 128, %v227_v26  ;;  %v233_v28 = vand.u32 15, %v227_v26  ;;  %s1126_s21 = smov 16   ;;  %s1127_s22 = smov 94  }
  0x11   :  { %s1128_s23 = smov 111   ;;  %s1129_s24 = smov 110  }
  0x12   :  { %v240_v29 = vand.u32 15, %v228_v27  ;;  %v261_v30 = vadd.s32 1, %v233_v28  ;;  %v253_v38 = vadd.s32 4294967295, %v233_v28  ;;  %s1130_s25 = smov 96   ;;  %s1131_s26 = smov 95  }
  0x13   :  { %s1132_s27 = smov 127   ;;  %s1133_s28 = smov 126  }
  0x14   :  { %v262_v32 = vadd.s32 1, %v240_v29  ;;  %vm265_vm5 = vcmp.lt.s32.totalorder %v261_v30, 16  ;;  %v254_v39 = vadd.s32 4294967295, %v240_v29  ;;  %vm255_vm8 = vcmp.ge.s32.totalorder %v253_v38, 0  ;;  %s1134_s29 = smov 112   ;;  %s1135_s12 = smov [#allocation8]  }
  0x15   :  { %v274_v33 = vld.sshfl [vmem:[#allocation1] sm:$0xff pattern:$0x75316420]  ;;  %v275_v34 = vld.sshfl [vmem:[#allocation1 + $0x8] sm:$0xff pattern:$0x75316420] }
  0x16   :  { %vm266_vm6 = vcmp.lt.s32.totalorder %v262_v32, 16  ;;  %673 = vst [vmem:[#allocation1] ss:$2 sm:$0xff] %v671_v31  ;;  %vm256_vm9 = vcmp.ge.s32.totalorder %v254_v39, 0  ;;  %v278_v45 = vpack.c.bf16 %v275_v34, %v274_v33  ;;  %s901_s1 = sshll.u32 %s1135_s12, 4  ;;  %s903_s15 = sshll.u32 %s1875_s6, 4  ;;  %s902_s1 = int_to_ptr.vmem [resolvable:$true] %s901_s1  ;;  %s904_s15 = int_to_ptr.hbm [resolvable:$true] %s903_s15 }
  0x17   :  { %vm327_vm7 = vmpackc.low %vm266_vm6, %vm265_vm5  ;;  %vm1885_vm6 = vcmask 138240  }
  0x18   :  { %v328_v36 = vsel %vm327_vm7, 65537, %v1120_v25  ;;  %vm303_vm10 = vmpackc.low %vm256_vm9, %vm255_vm8  ;;  %v280_v49 = vunpack.c.l.b16 %v278_v45  ;;  %v281_v57 = vunpack.c.h.b16 %v278_v45 }
  0x19   :  { %v329_v37 = vperm.slane %v328_v36, 0  ;;  %v330_v42 = vperm.slane %v328_v36, 4  ;;  %v304_v48 = vsel %vm303_vm10, 65537, %v1120_v25 }
  0x1a   :  { %v1201_v53 = vperm.slane %v304_v48, 4  ;;  %v282_v55 = vpack.c.b16 %v280_v49, %v280_v49  ;;  %v283_v58 = vpack.c.b16 %v281_v57, %v281_v57  ;;  %v1208_v0 = vperm.slane %v304_v48, 0 }
  0x1b   :  { %391 = vrot.lane.b32.xlu1 %v329_v37, %s1121_s16  ;;  %451 = vrot.lane.b32.xlu2 %v329_v37, %s1122_s17 }
  0x1d   :  { %v674_v59 = vld.sshfl [vmem:[#allocation1] sm:$0xff pattern:$0x75316420]  ;;  %v675_v60 = vld.sshfl [vmem:[#allocation1 + $0x8] sm:$0xff pattern:$0x75316420] }
  0x1e   :  { %v678_v61 = vpack.c.bf16 %v675_v60, %v674_v59 }
  0x20   :  { %v680_v62 = vunpack.c.l.b16 %v678_v61  ;;  %v681_v1 = vunpack.c.h.b16 %v678_v61 }
  0x22   :  { %v682_v63 = vpack.c.b16 %v680_v62, %v680_v62 }
  0x23   :  { %393 = vrot.lane.b32.xlu1 %v330_v42, %s1121_s16  ;;  %453 = vrot.lane.b32.xlu2 %v330_v42, %s1122_s17 }
  0x2b   :  { %423 = vrot.lane.b32.xlu1 %v1201_v53, %s1123_s18  ;;  %284 = vrot.lane.b32.xlu2 %v282_v55, %s1124_s19 }
  0x33   :  { %286 = vrot.lane.b32.xlu1 %v283_v58, %s1124_s19  ;;  %331 = vrot.lane.b32.xlu2 %v329_v37, %s1125_s20 }
  0x3b   :  { %333 = vrot.lane.b32.xlu1 %v330_v42, %s1125_s20  ;;  %361 = vrot.lane.b32.xlu2 %v1208_v0, %s1126_s21  ;;  %s1137_s20 = smov [#allocation7]  }
  0x43   :  { %684 = vrot.lane.b32.xlu1 %v682_v63, %s1124_s19 }
  0x8b   :  { %v1191_v2 = vpop.f32.mrf.mxu0 }
  0x8c   :  { %v84_v3 = vmul.f32 %v1191_v2, %v1191_v2 }
  0x8e   :  { %v86_v4 = vsel %vm85_vm1, %v84_v3, 0.0 }
  0x8f   :  { %87 = vadd.xlane.f32.xlu0 %v86_v4  ;;  %v1214_v4 = vpop.permute.xlu1 %391 }
 0x102   :  { %v88_v5 = vpop.xlane.xlu0 %87 }
 0x103   :  { %v89_v6 = vrot.slane %v88_v5, 4 }
 0x105   :  { %v90_v7 = vadd.f32 %v89_v6, %v88_v5 }
 0x107   :  { %v91_v8 = vrot.slane %v90_v7, 2 }
 0x109   :  { %v92_v9 = vadd.f32 %v91_v8, %v90_v7  ;;  %v452_v7 = vpop.permute.xlu2 %451  ;;  %v394_v8 = vpop.permute.xlu1 %393 }
 0x10a   :  { %v411_v26 = vunpack.c.l.b16 %v394_v8  ;;  %v412_v27 = vunpack.c.h.b16 %v394_v8  ;;  %v457_v32 = vunpack.c.l.b16 %v452_v7  ;;  %v458_v33 = vunpack.c.h.b16 %v452_v7 }
 0x10b   :  { %v93_v10 = vrot.slane %v92_v9, 1 }
 0x10d   :  { %v94_v11 = vadd.f32 %v93_v10, %v92_v9 }
 0x10f   :  { %941 = vpush %v94_v11  ;;  %v1220_v11 = vunpack.c.l.b16 %v1120_v25 }
 0x111   :  { %v454_v9 = vpop.permute.xlu2 %453  ;;  %vm1278_vm9 = vcmp.ne.s32.totalorder %v411_v26, %v1220_v11 }
 0x112   :  { %v456_v10 = vsel %vm455_vm0, %v452_v7, %v454_v9 }
 0x140   :  { %s942_s0 = spop %941 }
 0x141   :  { %v96_v12 = vstv %s942_s0 }
 0x142   :  { %978 = vrsqrt.f32 %v96_v12  ;;  %vm104_vm2 = vcmp.eq.f32.partialorder %v96_v12, inf  ;;  %v107_v20 = vand.u32 2147483648, %v96_v12  ;;  %vm106_vm3 = vcmp.eq.f32.partialorder %v96_v12, 0.0 }
 0x148   :  { %v979_v13 = vpop.eup %978 }
 0x149   :  { %v98_v14 = vmul.f32 %v979_v13, %v96_v12 }
 0x14b   :  { %v99_v15 = vmul.f32 %v979_v13, %v98_v14  ;;  %v471_v14 = vunpack.c.l.b16 %v454_v9 }
 0x14d   :  { %v100_v16 = vmul.f32 0.5, %v99_v15  ;;  %v472_v15 = vunpack.c.h.b16 %v454_v9 }
 0x14f   :  { %v101_v17 = vsub.f32 1.5, %v100_v16  ;;  %v464_v16 = vunpack.c.l.b16 %v456_v10 }
 0x151   :  { %v102_v18 = vmul.f32 %v979_v13, %v101_v17  ;;  %v1225_v13 = vpop.permute.xlu1 %423  ;;  %v465_v17 = vunpack.c.h.b16 %v456_v10 }
 0x152   :  { %v441_v37 = vunpack.c.l.b16 %v1225_v13  ;;  %v442_v38 = vunpack.c.h.b16 %v1225_v13 }
 0x153   :  { %v103_v19 = vmul.f32 %v102_v18, %v96_v12 }
 0x155   :  { %v105_v21 = vsel %vm104_vm2, %v96_v12, %v103_v19  ;;  %v1223_v12 = vunpack.c.h.b16 %v1120_v25 }
 0x156   :  { %v108_v22 = vsel %vm106_vm3, %v107_v20, %v105_v21  ;;  %vm1238_vm3 = vcmp.ne.s32.totalorder %v464_v16, %v1220_v11 }
 0x157   :  { %943 = vpush %v108_v22  ;;  %vm1233_vm2 = vcmp.ne.s32.totalorder %v472_v15, %v1223_v12  ;;  %vm1243_vm5 = vcmp.ne.s32.totalorder %v465_v17, %v1223_v12  ;;  %v285_v22 = vpop.permute.xlu2 %284  ;;  %vm1283_vm10 = vcmp.ne.s32.totalorder %v412_v27, %v1223_v12  ;;  %vm1318_vm0 = vcmp.ne.s32.totalorder %v458_v33, %v1223_v12 }
 0x158   :  { %vm1879_vm8 = vmpackc.low %vm1243_vm5, %vm1238_vm3  ;;  %v1303_v39 = vsel %vm1885_vm6, 0, %v285_v22  ;;  %v1938_v15 = vmov 0 }
 0x159   :  { %v287_v23 = vpop.permute.xlu1 %286 }
 0x15a   :  { %v1258_v24 = vsel %vm1885_vm6, %v287_v23, 0  ;;  %v1261_v25 = vsel %vm1885_vm6, %v285_v22, %v287_v23 }
 0x15b   :  { %v479_v29 = vsel %vm1879_vm8, %v1261_v25, 0  ;;  %v566_v57 = vrot.slane %v1258_v24, 2  ;;  %v485_v58 = vrot.slane %v1258_v24, 6 }
 0x15c   :  { %581 = vrot.lane.b32.xlu1 %v479_v29, %s1127_s22 }
 0x15f   :  { %v1289_v34 = vpop.permute.xlu2 %331 }
 0x164   :  { %527 = vrot.lane.b32.xlu1 %v1261_v25, %s1128_s23 }
 0x167   :  { %v1383_v59 = vpop.permute.xlu2 %361 }
 0x188   :  { %s944_s2 = spop %943 }
 0x189   :  { %s110_s4 = sadd.f32 1e-12, %s944_s2  ;;  %s914_s2 = sshll.u32 %s1876_s7, 4  ;;  %s915_s2 = int_to_ptr.hbm [resolvable:$true] %s914_s2 }
 0x18b   :  { %v111_v35 = vstv %s110_s4  ;;  %s1136_s4 = smov [#allocation10]  }
 0x18c   :  { %980 = vrcp.f32 %v111_v35  ;;  %v123_v44 = vand.u32 2147483648, %v111_v35  ;;  %v121_v47 = vand.u32 2147483647, %v111_v35  ;;  %vm117_vm12 = vweird.f32 %v111_v35  ;;  %s912_s16 = sshll.u32 %s1136_s4, 4  ;;  %s913_s16 = int_to_ptr.vmem [resolvable:$true] %s912_s16 }
 0x18e   :  { %v124_v51 = vor.u32 1.1754944e-38, %v123_v44  ;;  %vm122_vm14 = vcmp.eq.f32.partialorder %v121_v47, 8.507059e+37 }
 0x192   :  { %v981_v40 = vpop.eup %980 }
 0x193   :  { %v113_v41 = vmul.f32 %v981_v40, %v111_v35  ;;  %vm118_vm11 = vweird.f32 %v981_v40  ;;  %v334_v35 = vpop.permute.xlu1 %333 }
 0x194   :  { %vm119_vm13 = vmor %vm117_vm12, %vm118_vm11  ;;  %vm335_vm11 = vcmask 15360   ;;  %vm395_vm12 = vcmask 146432   ;;  %v351_v9 = vunpack.c.l.b16 %v334_v35  ;;  %v352_v10 = vunpack.c.h.b16 %v334_v35 }
 0x195   :  { %v114_v43 = vsub.f32 1.0, %v113_v41  ;;  %v1296_v36 = vsel %vm335_vm11, %v1289_v34, %v334_v35  ;;  %v396_v41 = vsel %vm395_vm12, %v1214_v4, %v394_v8  ;;  %vm1329_vm12 = vcmp.ne.s32.totalorder %v441_v37, %v1220_v11 }
 0x196   :  { %v404_v47 = vunpack.c.l.b16 %v396_v41  ;;  %v405_v48 = vunpack.c.h.b16 %v396_v41  ;;  %v1940_v41 = vmov 0 }
 0x197   :  { %v115_v46 = vmul.f32 %v981_v40, %v114_v43  ;;  %v368_v43 = vunpack.c.h.b16 %v1383_v59 }
 0x198   :  { %vm1351_vm8 = vcmp.ne.s32.totalorder %v404_v47, %v1220_v11 }
 0x199   :  { %v116_v50 = vadd.f32 %v981_v40, %v115_v46 }
 0x19b   :  { %v120_v52 = vsel %vm119_vm13, %v981_v40, %v116_v50  ;;  %vm1881_vm13 = vmpackc.low %vm1283_vm10, %vm1278_vm9  ;;  %v1928_v50 = vmov 0  ;;  %v1386_v60 = vpop.permute.xlu1 %684  ;;  %v367_v40 = vunpack.c.l.b16 %v1383_v59 }
 0x19c   :  { %v125_v54 = vsel %vm122_vm14, %v124_v51, %v120_v52  ;;  %vm1306_vm14 = vcmp.ne.s32.totalorder %v457_v32, %v1220_v11  ;;  %v420_v42 = vsel %vm1881_vm13, %v1258_v24, 0  ;;  %v1929_v50 = vsel %vm1351_vm8, 4294967295, %v1928_v50 }
 0x19d   :  { %v126_v56 = vmul.f32 %v125_v54, %v1191_v2  ;;  %v683_v2 = vpack.c.b16 %v681_v1, %v681_v1  ;;  %vm1880_vm11 = vmpackc.low %vm1318_vm0, %vm1306_vm14  ;;  %v539_v49 = vrot.slane %v420_v42, 6  ;;  %v1930_v51 = vmov 0 }
 0x19e   :  { %v478_v46 = vsel %vm1880_vm11, %v1303_v39, 0  ;;  %vm1356_vm11 = vcmp.ne.s32.totalorder %v405_v48, %v1223_v12  ;;  %v1942_v42 = vmov 0 }
 0x19f   :  { %936 = vmatmul.msk.f32.vlgmr.msra.gmra.mxu1 %vm1877_vm4, %v126_v56  ;;  %225 = vst.msk [vmem:[#allocation10] sm:$0x1] %vm85_vm1, %v126_v56  ;;  %686 = vrot.lane.b32.xlu2 %v683_v2, %s1124_s19  ;;  %vm1228_vm1 = vcmp.ne.s32.totalorder %v471_v14, %v1220_v11  ;;  %vm1334_vm4 = vcmp.ne.s32.totalorder %v442_v38, %v1223_v12  ;;  %v1931_v51 = vsel %vm1356_vm11, 4294967295, %v1930_v51  ;;  %vm1882_vm13 = vmpackc.low %vm1356_vm11, %vm1351_vm8  ;;  %v397_v2 = vunpack.c.l.b16 %v1214_v4  ;;  %s889_s19 = sshll.u32 %s1874_s5, 4  ;;  %s890_s19 = int_to_ptr.hbm [resolvable:$true] %s889_s19 }
 0x1a0   :  { %vm477_vm7 = vmpackc.low %vm1233_vm2, %vm1228_vm1  ;;  %v419_v54 = vsel %vm1882_vm13, %v1261_v25, 0  ;;  %vm1426_vm2 = vcmp.ne.s32.totalorder %v351_v9, %v1220_v11  ;;  %v1936_v14 = vmov 0  ;;  %v338_v9 = vunpack.c.h.b16 %v1289_v34 }
 0x1a1   :  { %v480_v28 = vsel %vm477_vm7, %v1258_v24, 0  ;;  %v538_v55 = vrot.slane %v419_v54, 6  ;;  %vm1405_vm13 = vcmp.ne.s32.totalorder %v397_v2, %v1220_v11  ;;  %v1937_v14 = vsel %vm1426_vm2, 4294967295, %v1936_v14 }
 0x1a3   :  { %542 = vrot.lane.b32.xlu1 %v538_v55, %s1129_s24 }
 0x1a7   :  { %583 = vrot.lane.b32.xlu2 %v480_v28, %s1127_s22 }
 0x1af   :  { %529 = vrot.lane.b32.xlu2 %v1258_v24, %s1128_s23 }
 0x1b7   :  { %544 = vrot.lane.b32.xlu2 %v539_v49, %s1129_s24 }
 0x1f9   :  { %v687_v61 = vpop.permute.xlu2 %686 }
 0x1fa   :  { %v1390_v62 = vsel %vm1885_vm6, %v1386_v60, %v687_v61  ;;  %v1393_v63 = vsel %vm1885_vm6, %v687_v61, 0  ;;  %vm425_vm6 = vcmask 261120  }
 0x1fb   :  { %v712_v1 = vsel %vm477_vm7, %v1393_v63, 0  ;;  %vm1431_vm7 = vcmp.ne.s32.totalorder %v352_v10, %v1223_v12  ;;  %v344_v10 = vunpack.c.l.b16 %v1296_v36 }
 0x1fc   :  { %v1939_v15 = vsel %vm1431_vm7, 4294967295, %v1938_v15 }
 0x21c   :  { %v1212_v3 = vpop.f32.mrf.mxu1 }
 0x21d   :  { %v154_v5 = vmul.f32 %v1212_v3, %v1212_v3 }
 0x21f   :  { %v156_v6 = vsel %vm1878_vm15, %v154_v5, 0.0  ;;  %vm1883_vm15 = vmpackc.low %vm1334_vm4, %vm1329_vm12  ;;  %v398_v5 = vunpack.c.h.b16 %v1214_v4 }
 0x220   :  { %157 = vadd.xlane.f32.xlu0 %v156_v6  ;;  %v450_v52 = vsel %vm1883_vm15, %v1258_v24, 0 }
 0x221   :  { %v554_v56 = vrot.slane %v450_v52, 4  ;;  %vm1410_vm15 = vcmp.ne.s32.totalorder %v398_v5, %v1223_v12  ;;  %v565_v5 = vrot.slane %v1261_v25, 2 }
 0x222   :  { %vm1884_vm1 = vmpackc.low %vm1410_vm15, %vm1405_vm13 }
 0x223   :  { %559 = vrot.lane.b32.xlu2 %v554_v56, %s1130_s25  ;;  %v418_v4 = vsel %vm1884_vm1, %v1303_v39, 0  ;;  %vm1886_vm1 = vmpackc.low %vm1431_vm7, %vm1426_vm2 }
 0x224   :  { %v537_v8 = vrot.slane %v418_v4, 6  ;;  %v360_v16 = vsel %vm1886_vm1, %v1258_v24, 0  ;;  %v483_v4 = vrot.slane %v1303_v39, 6 }
 0x225   :  { %v500_v17 = vrot.slane %v360_v16, 4  ;;  %v345_v16 = vunpack.c.h.b16 %v1296_v36 }
 0x22b   :  { %571 = vrot.lane.b32.xlu2 %v566_v57, %s1131_s26  ;;  %v1948_v57 = vmov 0 }
 0x233   :  { %490 = vrot.lane.b32.xlu2 %v485_v58, %s1132_s27  ;;  %v1950_v58 = vmov 0 }
 0x234   :  { %421 = vrot.lane.b32.xlu0 %v1208_v0, %s1123_s18 }
 0x23b   :  { %808 = vrot.lane.b32.xlu2 %v712_v1, %s1127_s22  ;;  %v564_v1 = vrot.slane %v1303_v39, 2 }
 0x23c   :  { %363 = vrot.lane.b32.xlu0 %v1201_v53, %s1126_s21 }
 0x243   :  { %505 = vrot.lane.b32.xlu2 %v500_v17, %s1133_s28 }
 0x244   :  { %579 = vrot.lane.b32.xlu0 %v478_v46, %s1127_s22  ;;  %v1946_v46 = vmov 0 }
 0x24c   :  { %525 = vrot.lane.b32.xlu0 %v1303_v39, %s1128_s23 }
 0x254   :  { %540 = vrot.lane.b32.xlu0 %v537_v8, %s1129_s24  ;;  %v484_v8 = vrot.slane %v1261_v25, 6 }
 0x293   :  { %v158_v18 = vpop.xlane.xlu0 %157 }
 0x294   :  { %v159_v19 = vrot.slane %v158_v18, 4 }
 0x296   :  { %v160_v22 = vadd.f32 %v159_v19, %v158_v18 }
 0x298   :  { %v161_v23 = vrot.slane %v160_v22, 2 }
 0x29a   :  { %v162_v26 = vadd.f32 %v161_v23, %v160_v22 }
 0x29c   :  { %v163_v27 = vrot.slane %v162_v26, 1 }
 0x29e   :  { %v164_v28 = vadd.f32 %v163_v27, %v162_v26  ;;  %v584_v26 = vpop.permute.xlu2 %583  ;;  %v582_v27 = vpop.permute.xlu1 %581 }
 0x2a0   :  { %945 = vpush %v164_v28 }
 0x2a6   :  { %v422_v29 = vpop.permute.xlu0 %421 }
 0x2a7   :  { %v426_v32 = vsel %vm425_vm6, %v422_v29, %v1225_v13  ;;  %v427_v33 = vunpack.c.l.b16 %v422_v29  ;;  %v428_v35 = vunpack.c.h.b16 %v422_v29  ;;  %v1944_v13 = vmov 0 }
 0x2a8   :  { %v434_v37 = vunpack.c.l.b16 %v426_v32  ;;  %v435_v38 = vunpack.c.h.b16 %v426_v32 }
 0x2a9   :  { %vm1448_vm1 = vcmp.ne.s32.totalorder %v427_v33, %v1220_v11  ;;  %vm1453_vm8 = vcmp.ne.s32.totalorder %v428_v35, %v1223_v12 }
 0x2aa   :  { %v1941_v41 = vsel %vm1448_vm1, 4294967295, %v1940_v41  ;;  %v1943_v42 = vsel %vm1453_vm8, 4294967295, %v1942_v42  ;;  %vm1891_vm11 = vmpackc.low %vm1453_vm8, %vm1448_vm1  ;;  %vm1462_vm6 = vcmp.ne.s32.totalorder %v434_v37, %v1220_v11  ;;  %vm1467_vm2 = vcmp.ne.s32.totalorder %v435_v38, %v1223_v12 }
 0x2ab   :  { %v1945_v13 = vsel %vm1462_vm6, 4294967295, %v1944_v13  ;;  %v1947_v46 = vsel %vm1467_vm2, 4294967295, %v1946_v46  ;;  %v448_v47 = vsel %vm1891_vm11, %v1303_v39, 0  ;;  %vm1893_vm7 = vmpackc.low %vm1467_vm2, %vm1462_vm6  ;;  %vm1953_vm6 = vcmask 138240  }
 0x2ac   :  { %v552_v48 = vrot.slane %v448_v47, 4  ;;  %v449_v49 = vsel %vm1893_vm7, %v1261_v25, 0  ;;  %v1532_v18 = vsel %vm1953_vm6, 0, %v1386_v60  ;;  %vm365_vm2 = vcmask 130048  }
 0x2ad   :  { %v553_v52 = vrot.slane %v449_v49, 4  ;;  %vm1601_vm6 = vcmp.ne.s32.totalorder %v367_v40, %v1220_v11  ;;  %v1969_v38 = vmov 0 }
 0x2ae   :  { %555 = vrot.lane.b32.xlu0 %v552_v48, %s1130_s25  ;;  %v364_v54 = vpop.permute.xlu0 %363 }
 0x2af   :  { %v381_v55 = vunpack.c.l.b16 %v364_v54  ;;  %v382_v56 = vunpack.c.h.b16 %v364_v54  ;;  %557 = vrot.lane.b32.xlu1 %v553_v52, %s1130_s25  ;;  %v366_v19 = vsel %vm365_vm2, %v1383_v59, %v364_v54  ;;  %v792_v54 = vrot.slane %v1393_v63, 2 }
 0x2b0   :  { %v374_v21 = vunpack.c.l.b16 %v366_v19  ;;  %v375_v20 = vunpack.c.h.b16 %v366_v19 }
 0x2b1   :  { %vm1490_vm11 = vcmp.ne.s32.totalorder %v381_v55, %v1220_v11  ;;  %vm1495_vm1 = vcmp.ne.s32.totalorder %v382_v56, %v1223_v12 }
 0x2b2   :  { %v1949_v57 = vsel %vm1490_vm11, 4294967295, %v1948_v57  ;;  %v1951_v58 = vsel %vm1495_vm1, 4294967295, %v1950_v58  ;;  %vm1894_vm7 = vmpackc.low %vm1495_vm1, %vm1490_vm11  ;;  %vm1540_vm11 = vcmp.ne.s32.totalorder %v338_v9, %v1223_v12  ;;  %vm1545_vm1 = vcmp.ne.s32.totalorder %v344_v10, %v1220_v11 }
 0x2b3   :  { %v390_v61 = vsel %vm1894_vm7, %v1258_v24, 0  ;;  %v337_v24 = vunpack.c.l.b16 %v1289_v34  ;;  %vm1952_vm7 = vmpackc.low %vm1283_vm10, %vm1278_vm9  ;;  %vm1550_vm9 = vcmp.ne.s32.totalorder %v345_v16, %v1223_v12 }
 0x2b4   :  { %v515_v2 = vrot.slane %v390_v61, 2  ;;  %v706_v17 = vsel %vm1952_vm7, %v1393_v63, 0  ;;  %vm1962_vm10 = vmpackc.low %vm1318_vm0, %vm1306_vm14 }
 0x2b5   :  { %vm1535_vm8 = vcmp.ne.s32.totalorder %v337_v24, %v1220_v11  ;;  %v767_v31 = vrot.slane %v706_v17, 6  ;;  %v710_v22 = vsel %vm1962_vm10, %v1532_v18, 0  ;;  %vm1963_vm7 = vmpackc.low %vm1243_vm5, %vm1238_vm3  ;;  %vm1901_vm3 = vcmask 769024  }
 0x2b6   :  { %567 = vrot.lane.b32.xlu0 %v564_v1, %s1131_s26  ;;  %520 = vrot.lane.b32.xlu2 %v515_v2, %s1134_s29  ;;  %v711_v23 = vsel %vm1963_vm7, %v1390_v62, 0  ;;  %vm1905_vm2 = vmpackc.low %vm1540_vm11, %vm1535_vm8  ;;  %vm1902_vm5 = vcmask 1041408   ;;  %v587_v29 = vsel %vm1901_vm3, %v582_v27, %v584_v26  ;;  %vm1606_vm10 = vcmp.ne.s32.totalorder %v368_v43, %v1223_v12 }
 0x2b7   :  { %569 = vrot.lane.b32.xlu1 %v565_v5, %s1131_s26  ;;  %vm1904_vm14 = vmpackc.low %vm1550_vm9, %vm1545_vm1  ;;  %v358_v59 = vsel %vm1905_vm2, %v1303_v39, 0  ;;  %v630_v33 = vsel %vm1902_vm5, %v587_v29, 0  ;;  %v717_v5 = vrot.slane %v1393_v63, 6  ;;  %vm1978_vm2 = vnez %v1929_v50 }
 0x2b8   :  { %vm1964_vm0 = vmpackc.low %vm1334_vm4, %vm1329_vm12  ;;  %v359_v32 = vsel %vm1904_vm14, %v1261_v25, 0  ;;  %650 = vmatpush.bf16.msra.mxu3 %v630_v33  ;;  %v498_v45 = vrot.slane %v358_v59, 4  ;;  %vm1611_vm4 = vcmp.ne.s32.totalorder %v374_v21, %v1220_v11  ;;  %vm1616_vm12 = vcmp.ne.s32.totalorder %v375_v20, %v1223_v12 }
 0x2b9   :  { %v709_v28 = vsel %vm1964_vm0, %v1393_v63, 0  ;;  %v1970_v38 = vsel %vm1611_vm4, 4294967295, %v1969_v38  ;;  %v499_v48 = vrot.slane %v359_v32, 4  ;;  %vm1903_vm7 = vmpackc.low %vm1606_vm10, %vm1601_vm6  ;;  %vm1977_vm14 = vnez %v1931_v51 }
 0x2ba   :  { %v781_v37 = vrot.slane %v709_v28, 4  ;;  %vm1900_vm0 = vmpackc.low %vm1616_vm12, %vm1611_vm4  ;;  %v388_v49 = vsel %vm1903_vm7, %v1303_v39, 0 }
 0x2bb   :  { %v389_v55 = vsel %vm1900_vm0, %v1261_v25, 0  ;;  %v513_v56 = vrot.slane %v388_v49, 2  ;;  %vm1973_vm0 = vmpackc.low %vm1410_vm15, %vm1405_vm13 }
 0x2bc   :  { %v514_v61 = vrot.slane %v389_v55, 2  ;;  %v704_v17 = vsel %vm1973_vm0, %v1532_v18, 0  ;;  %vm1979_vm4 = vmpackc.low %vm1977_vm14, %vm1978_vm2  ;;  %vm1980_vm2 = vnez %v1951_v58  ;;  %vm1981_vm14 = vnez %v1949_v57 }
 0x2bd   :  { %v705_v19 = vsel %vm1979_vm4, %v1390_v62, 0  ;;  %v765_v7 = vrot.slane %v704_v17, 6  ;;  %vm1984_vm4 = vnez %v1941_v41  ;;  %vm1986_vm0 = vnez %v1947_v46 }
 0x2be   :  { %486 = vrot.lane.b32.xlu0 %v483_v4, %s1132_s27  ;;  %758 = vrot.lane.b32.xlu2 %v1393_v63, %s1128_s23  ;;  %v580_v4 = vpop.permute.xlu0 %579  ;;  %v766_v40 = vrot.slane %v705_v19, 6  ;;  %v791_v41 = vrot.slane %v1390_v62, 2  ;;  %v716_v46 = vrot.slane %v1390_v62, 6 }
 0x2bf   :  { %488 = vrot.lane.b32.xlu1 %v484_v8, %s1132_s27  ;;  %v586_v24 = vsel %vm1901_vm3, %v580_v4, %v582_v27  ;;  %vm1974_vm3 = vnez %v1939_v15 }
 0x2c0   :  { %v627_v9 = vsel %vm1902_vm5, %v586_v24, 0  ;;  %vm1975_vm5 = vnez %v1937_v14 }
 0x2c1   :  { %637 = vmatpush.bf16.msra.mxu2 %v627_v9  ;;  %vm1976_vm7 = vmpackc.low %vm1974_vm3, %vm1975_vm5  ;;  %vm1983_vm5 = vnez %v1943_v42  ;;  %v530_v42 = vpop.permute.xlu2 %529 }
 0x2c2   :  { %vm1982_vm3 = vmpackc.low %vm1980_vm2, %vm1981_vm14 }
 0x2c3   :  { %v703_v50 = vsel %vm1982_vm3, %v1393_v63, 0  ;;  %vm1989_vm2 = vmpackc.low %vm1540_vm11, %vm1535_vm8  ;;  %vm1992_vm11 = vnez %v1970_v38  ;;  %vm1994_vm3 = vcmask 1041408  }
 0x2c4   :  { %v745_v58 = vrot.slane %v703_v50, 2  ;;  %v698_v26 = vsel %vm1989_vm2, %v1532_v18, 0  ;;  %vm1990_vm14 = vmpackc.low %vm1550_vm9, %vm1545_vm1  ;;  %vm531_vm9 = vcmask 908288  }
 0x2c5   :  { %v699_v27 = vsel %vm1990_vm14, %v1390_v62, 0  ;;  %v729_v28 = vrot.slane %v698_v26, 4  ;;  %vm1991_vm8 = vmpackc.low %vm1606_vm10, %vm1601_vm6  ;;  %vm546_vm6 = vcmask 900096   ;;  %vm561_vm10 = vcmask 785408  }
 0x2c6   :  { %804 = vrot.lane.b32.xlu0 %v710_v22, %s1127_s22  ;;  %772 = vrot.lane.b32.xlu2 %v767_v31, %s1129_s24  ;;  %v700_v31 = vsel %vm1976_vm7, %v1393_v63, 0  ;;  %vm1985_vm7 = vmpackc.low %vm1983_vm5, %vm1984_vm4  ;;  %v790_v63 = vrot.slane %v1532_v18, 2  ;;  %v730_v29 = vrot.slane %v699_v27, 4  ;;  %v701_v34 = vsel %vm1991_vm8, %v1532_v18, 0  ;;  %v526_v33 = vpop.permute.xlu0 %525 }
 0x2c7   :  { %806 = vrot.lane.b32.xlu1 %v711_v23, %s1127_s22  ;;  %v731_v23 = vrot.slane %v700_v31, 4  ;;  %v707_v15 = vsel %vm1985_vm7, %v1532_v18, 0  ;;  %vm1993_vm1 = vmpackc.low %vm1616_vm12, %vm1992_vm11  ;;  %v743_v30 = vrot.slane %v701_v34, 2  ;;  %vm595_vm12 = vcmask 1043456   ;;  %s887_s22 = sshll.u32 %s1137_s20, 4  ;;  %s888_s22 = int_to_ptr.vmem [resolvable:$true] %s887_s22 }
 0x2c8   :  { %v779_v20 = vrot.slane %v707_v15, 4  ;;  %v702_v36 = vsel %vm1993_vm1, %v1390_v62, 0  ;;  %vm573_vm5 = vcmask 777216   ;;  %vm600_vm7 = vcmask 1045504  }
 0x2c9   :  { %v545_v59 = vpop.permute.xlu2 %544  ;;  %v744_v32 = vrot.slane %v702_v36, 2  ;;  %vm1996_vm14 = vcmask 57344   ;;  %vm1998_vm11 = vcmask 769024   ;;  %v314_v34 = vunpack.c.l.b16 %v1201_v53 }
 0x2ca   :  { %vm1997_vm8 = vmmov %vm1996_vm14  ;;  %v315_v36 = vunpack.c.h.b16 %v1201_v53 }
 0x2cb   :  { %vm1999_vm1 = vmmov %vm1998_vm11 }
 0x2ce   :  { %501 = vrot.lane.b32.xlu0 %v498_v45, %s1133_s28  ;;  %786 = vrot.lane.b32.xlu2 %v781_v37, %s1130_s25  ;;  %v528_v45 = vpop.permute.xlu1 %527  ;;  %v541_v35 = vpop.permute.xlu0 %540 }
 0x2cf   :  { %503 = vrot.lane.b32.xlu1 %v499_v48, %s1133_s28 }
 0x2d1   :  { %s946_s30 = spop %945  ;;  %v560_v60 = vpop.permute.xlu2 %559 }
 0x2d2   :  { %v166_v52 = vstv %s946_s30 }
 0x2d3   :  { %982 = vrsqrt.f32 %v166_v52  ;;  %vm174_vm15 = vcmp.eq.f32.partialorder %v166_v52, inf  ;;  %v177_v43 = vand.u32 2147483648, %v166_v52  ;;  %vm176_vm13 = vcmp.eq.f32.partialorder %v166_v52, 0.0 }
 0x2d6   :  { %516 = vrot.lane.b32.xlu0 %v513_v56, %s1134_s29  ;;  %797 = vrot.lane.b32.xlu2 %v792_v54, %s1131_s26  ;;  %v543_v37 = vpop.permute.xlu1 %542  ;;  %v532_v54 = vsel %vm531_vm9, %v526_v33, %v528_v45 }
 0x2d7   :  { %518 = vrot.lane.b32.xlu1 %v514_v61, %s1134_s29  ;;  %v547_v55 = vsel %vm546_vm6, %v541_v35, %v543_v37  ;;  %v533_v61 = vsel %vm531_vm9, %v528_v45, %v530_v42 }
 0x2d8   :  { %v609_v4 = vsel %vm1994_vm3, %v532_v54, %v547_v55 }
 0x2d9   :  { %v983_v1 = vpop.eup %982  ;;  %v572_v44 = vpop.permute.xlu2 %571 }
 0x2da   :  { %v168_v2 = vmul.f32 %v983_v1, %v166_v52 }
 0x2dc   :  { %v169_v8 = vmul.f32 %v983_v1, %v168_v2 }
 0x2de   :  { %754 = vrot.lane.b32.xlu0 %v1532_v18, %s1128_s23  ;;  %722 = vrot.lane.b32.xlu2 %v717_v5, %s1132_s27  ;;  %v170_v10 = vmul.f32 0.5, %v169_v8 }
 0x2df   :  { %756 = vrot.lane.b32.xlu1 %v1390_v62, %s1128_s23  ;;  %s1138_s23 = smov 256  }
 0x2e0   :  { %v171_v16 = vsub.f32 1.5, %v170_v10 }
 0x2e1   :  { %v1733_v38 = vpop.permute.xlu2 %490 }
 0x2e2   :  { %v172_v22 = vmul.f32 %v983_v1, %v171_v16  ;;  %v548_v1 = vsel %vm546_vm6, %v543_v37, %v545_v59 }
 0x2e4   :  { %v173_v6 = vmul.f32 %v172_v22, %v166_v52 }
 0x2e6   :  { %768 = vrot.lane.b32.xlu0 %v765_v7, %s1129_s24  ;;  %736 = vrot.lane.b32.xlu2 %v731_v23, %s1133_s28  ;;  %v175_v14 = vsel %vm174_vm15, %v166_v52, %v173_v6  ;;  %vm1987_vm15 = vnez %v1945_v13  ;;  %v715_v13 = vrot.slane %v1532_v18, 6 }
 0x2e7   :  { %770 = vrot.lane.b32.xlu1 %v766_v40, %s1129_s24  ;;  %v178_v51 = vsel %vm176_vm13, %v177_v43, %v175_v14  ;;  %vm1988_vm13 = vmpackc.low %vm1986_vm0, %vm1987_vm15 }
 0x2e8   :  { %947 = vpush %v178_v51  ;;  %v708_v21 = vsel %vm1988_vm13, %v1390_v62, 0  ;;  %vm1995_vm0 = vmmov %vm1994_vm3 }
 0x2e9   :  { %v780_v57 = vrot.slane %v708_v21, 4  ;;  %v612_v17 = vsel %vm1995_vm0, %v533_v61, %v548_v1  ;;  %v809_v40 = vpop.permute.xlu2 %808  ;;  %vm2000_vm3 = vmmov %vm1995_vm0 }
 0x2ee   :  { %782 = vrot.lane.b32.xlu0 %v779_v20, %s1130_s25  ;;  %750 = vrot.lane.b32.xlu2 %v745_v58, %s1134_s29 }
 0x2ef   :  { %784 = vrot.lane.b32.xlu1 %v780_v57, %s1130_s25 }
 0x2f1   :  { %v506_v57 = vpop.permute.xlu2 %505 }
 0x2f6   :  { %793 = vrot.lane.b32.xlu0 %v790_v63, %s1131_s26 }
 0x2f7   :  { %795 = vrot.lane.b32.xlu1 %v791_v41, %s1131_s26 }
 0x2fe   :  { %718 = vrot.lane.b32.xlu0 %v715_v13, %s1132_s27 }
 0x2ff   :  { %720 = vrot.lane.b32.xlu1 %v716_v46, %s1132_s27 }
 0x306   :  { %732 = vrot.lane.b32.xlu0 %v729_v28, %s1133_s28 }
 0x307   :  { %734 = vrot.lane.b32.xlu1 %v730_v29, %s1133_s28  ;;  %v307_v29 = vunpack.c.l.b16 %v1208_v0 }
 0x30e   :  { %746 = vrot.lane.b32.xlu0 %v743_v30, %s1134_s29 }
 0x30f   :  { %748 = vrot.lane.b32.xlu1 %v744_v32, %s1134_s29 }
 0x310   :  { %v521_v28 = vpop.permute.xlu2 %520 }
 0x319   :  { %s948_s8 = spop %947 }
 0x31a   :  { %s180_s9 = sadd.f32 1e-12, %s948_s8 }
 0x31c   :  { %v181_v48 = vstv %s180_s9 }
 0x31d   :  { %984 = vrcp.f32 %v181_v48  ;;  %v193_v8 = vand.u32 2147483648, %v181_v48  ;;  %v191_v10 = vand.u32 2147483647, %v181_v48  ;;  %vm187_vm15 = vweird.f32 %v181_v48 }
 0x31f   :  { %v194_v43 = vor.u32 1.1754944e-38, %v193_v8  ;;  %vm192_vm2 = vcmp.eq.f32.partialorder %v191_v10, 8.507059e+37 }
 0x320   :  { %v556_v47 = vpop.permute.xlu0 %555 }
 0x321   :  { %v558_v49 = vpop.permute.xlu1 %557 }
 0x322   :  { %v562_v5 = vsel %vm561_vm10, %v556_v47, %v558_v49  ;;  %v563_v24 = vsel %vm561_vm10, %v558_v49, %v560_v60 }
 0x323   :  { %v985_v52 = vpop.eup %984  ;;  %v614_v19 = vsel %vm595_vm12, %v609_v4, %v562_v5  ;;  %v616_v6 = vsel %vm595_vm12, %v612_v17, %v563_v24 }
 0x324   :  { %v183_v56 = vmul.f32 %v985_v52, %v181_v48  ;;  %vm188_vm4 = vweird.f32 %v985_v52 }
 0x325   :  { %vm189_vm13 = vmor %vm187_vm15, %vm188_vm4 }
 0x326   :  { %v184_v2 = vsub.f32 1.0, %v183_v56  ;;  %vm2001_vm4 = vmmov %vm1995_vm0  ;;  %vm1762_vm0 = vcmp.ne.s32.totalorder %v307_v29, %v1220_v11 }
 0x328   :  { %v185_v9 = vmul.f32 %v985_v52, %v184_v2  ;;  %v568_v16 = vpop.permute.xlu0 %567 }
 0x329   :  { %v570_v31 = vpop.permute.xlu1 %569 }
 0x32a   :  { %v186_v22 = vadd.f32 %v985_v52, %v185_v9  ;;  %v574_v7 = vsel %vm573_vm5, %v568_v16, %v570_v31  ;;  %v575_v23 = vsel %vm573_vm5, %v570_v31, %v572_v44 }
 0x32b   :  { %v618_v14 = vsel %vm600_vm7, %v614_v19, %v574_v7  ;;  %v621_v51 = vsel %vm600_vm7, %v616_v6, %v575_v23 }
 0x32c   :  { %638 = vmatpush.bf16.msra.mxu2 %v618_v14  ;;  %651 = vmatpush.bf16.msra.mxu3 %v621_v51  ;;  %v190_v50 = vsel %vm189_vm13, %v985_v52, %v186_v22  ;;  %vm1772_vm13 = vcmp.ne.s32.totalorder %v314_v34, %v1220_v11  ;;  %v269_v14 = vld [vmem:[#allocation2] sm:$0xf] }
 0x32d   :  { %v195_v15 = vsel %vm192_vm2, %v194_v43, %v190_v50  ;;  %vm1777_vm2 = vcmp.ne.s32.totalorder %v315_v36, %v1223_v12 }
 0x32e   :  { %v196_v21 = vmul.f32 %v195_v15, %v1212_v3 }
 0x330   :  { %v487_v58 = vpop.permute.xlu0 %486  ;;  %224 = vst.msk [vmem:[#allocation8] sm:$0x1] %vm1996_vm14, %v196_v21  ;;  %v197_v63 = vmul.f32 %v196_v21, %v1212_v3  ;;  %v308_v3 = vunpack.c.h.b16 %v1208_v0  ;;  %vm1907_vm14 = vcmask 1039360  }
 0x331   :  { %v489_v20 = vpop.permute.xlu1 %488  ;;  %906 = dma.vmem_to_hbm [thread:$0]  %s902_s1, 16, %s904_s15, [#allocation9]  }
 0x332   :  { %v198_v41 = vsel %vm1997_vm8, %v197_v63, 0.0  ;;  %vm1767_vm15 = vcmp.ne.s32.totalorder %v308_v3, %v1223_v12  ;;  %v493_v0 = vsel %vm1907_vm14, %v487_v58, %v489_v20  ;;  %v494_v11 = vsel %vm1907_vm14, %v489_v20, %v1733_v38  ;;  %v759_v12 = vpop.permute.xlu2 %758  ;;  %vm2010_vm14 = vmmov %vm2001_vm4  ;;  %917 = dma.vmem_to_hbm [thread:$0]  %s913_s16, 16, %s915_s2, [#allocation9]  }
 0x333   :  { %vm313_vm8 = vmpackc.low %vm1767_vm15, %vm1762_vm0 }
 0x334   :  { %v321_v37 = vsel %vm313_vm8, %v1303_v39, 0  ;;  %v696_v3 = vsel %vm313_vm8, %v1532_v18, 0 }
 0x335   :  { %v591_v38 = vsel %vm2001_vm4, %v321_v37, %v493_v0 }
 0x338   :  { %199 = vadd.xlane.f32.xlu0 %v198_v41  ;;  %v805_v42 = vpop.permute.xlu0 %804 }
 0x339   :  { %v807_v13 = vpop.permute.xlu1 %806 }
 0x33a   :  { %v810_v46 = vsel %vm1998_vm11, %v805_v42, %v807_v13  ;;  %v811_v26 = vsel %vm1999_vm1, %v807_v13, %v809_v40  ;;  %vm507_vm11 = vcmask 1031168   ;;  %vm320_vm1 = vmpackc.low %vm1777_vm2, %vm1772_vm13  ;;  %v773_v2 = vpop.permute.xlu2 %772 }
 0x33b   :  { %v845_v27 = vsel %vm2000_vm3, %v810_v46, 0  ;;  %v848_v59 = vsel %vm2001_vm4, %v811_v26, 0  ;;  %vm522_vm3 = vcmask 916480   ;;  %v322_v48 = vsel %vm320_vm1, %v1261_v25, 0 }
 0x33c   :  { %855 = vmatpush.bf16.msrb.mxu0 %v845_v27  ;;  %868 = vmatpush.bf16.msrb.mxu1 %v848_v59  ;;  %v594_v49 = vsel %vm2010_vm14, %v322_v48, %v494_v11  ;;  %vm2011_vm14 = vmmov %vm2001_vm4  ;;  %v697_v34 = vsel %vm320_vm1, %v1390_v62, 0  ;;  %v270_v62 = vld [vmem:[%s1872_s3] sm:$0xff] }
 0x33d   :  { %663 = vperm.xlu1 %976, %v270_v62  }
 0x340   :  { %v502_v30 = vpop.permute.xlu0 %501 }
 0x341   :  { %v504_v33 = vpop.permute.xlu1 %503 }
 0x342   :  { %v508_v44 = vsel %vm507_vm11, %v502_v30, %v504_v33  ;;  %v509_v35 = vsel %vm507_vm11, %v504_v33, %v506_v57  ;;  %v787_v17 = vpop.permute.xlu2 %786 }
 0x343   :  { %v597_v56 = vsel %vm595_vm12, %v591_v38, %v508_v44  ;;  %v599_v39 = vsel %vm595_vm12, %v594_v49, %v509_v35 }
 0x348   :  { %v517_v47 = vpop.permute.xlu0 %516 }
 0x349   :  { %v519_v52 = vpop.permute.xlu1 %518 }
 0x34a   :  { %v523_v54 = vsel %vm522_vm3, %v517_v47, %v519_v52  ;;  %v524_v55 = vsel %vm522_vm3, %v519_v52, %v521_v28  ;;  %v798_v51 = vpop.permute.xlu2 %797 }
 0x34b   :  { %v602_v61 = vsel %vm600_vm7, %v597_v56, %v523_v54  ;;  %v605_v1 = vsel %vm600_vm7, %v599_v39, %v524_v55 }
 0x34c   :  { %639 = vmatpush.bf16.msra.mxu2 %v602_v61  ;;  %652 = vmatpush.bf16.msra.mxu3 %v605_v1 }
 0x350   :  { %v755_v25 = vpop.permute.xlu0 %754 }
 0x351   :  { %v757_v5 = vpop.permute.xlu1 %756 }
 0x352   :  { %v760_v24 = vsel %vm531_vm9, %v755_v25, %v757_v5  ;;  %v761_v9 = vsel %vm531_vm9, %v757_v5, %v759_v12  ;;  %vm2012_vm9 = vcmask 293888   ;;  %v723_v63 = vpop.permute.xlu2 %722 }
 0x353   :  { %937 = vmatmul.msk.bf16.vlgmr.msra.gmra.mxu2 %vm2012_vm9, %v269_v14 }
 0x358   :  { %v769_v4 = vpop.permute.xlu0 %768 }
 0x359   :  { %v771_v8 = vpop.permute.xlu1 %770 }
 0x35a   :  { %v774_v10 = vsel %vm546_vm6, %v769_v4, %v771_v8  ;;  %v775_v16 = vsel %vm546_vm6, %v771_v8, %v773_v2  ;;  %vm2013_vm6 = vmmov %vm2012_vm9  ;;  %v737_v46 = vpop.permute.xlu2 %736 }
 0x35b   :  { %v830_v31 = vsel %vm2011_vm14, %v760_v24, %v774_v10  ;;  %v833_v19 = vsel %vm2001_vm4, %v761_v9, %v775_v16  ;;  %938 = vmatmul.msk.bf16.vlgmr.msra.gmra.mxu3 %vm2013_vm6, %v269_v14  ;;  %vm2017_vm0 = vmmov %vm2013_vm6 }
 0x35c   :  { %vm2018_vm15 = vmmov %vm2017_vm0 }
 0x360   :  { %v783_v22 = vpop.permute.xlu0 %782 }
 0x361   :  { %v785_v7 = vpop.permute.xlu1 %784 }
 0x362   :  { %v788_v23 = vsel %vm561_vm10, %v783_v22, %v785_v7  ;;  %v789_v6 = vsel %vm561_vm10, %v785_v7, %v787_v17  ;;  %vm2014_vm10 = vcmask 1039360   ;;  %v751_v30 = vpop.permute.xlu2 %750 }
 0x363   :  { %v835_v40 = vsel %vm595_vm12, %v830_v31, %v788_v23  ;;  %v837_v43 = vsel %vm595_vm12, %v833_v19, %v789_v6  ;;  %vm2015_vm14 = vmmov %vm2014_vm10 }
 0x368   :  { %v794_v50 = vpop.permute.xlu0 %793 }
 0x369   :  { %v796_v15 = vpop.permute.xlu1 %795 }
 0x36a   :  { %v799_v21 = vsel %vm573_vm5, %v794_v50, %v796_v15  ;;  %v800_v58 = vsel %vm573_vm5, %v796_v15, %v798_v51  ;;  %vm2016_vm5 = vmmov %vm2001_vm4 }
 0x36b   :  { %v839_v20 = vsel %vm600_vm7, %v835_v40, %v799_v21  ;;  %v842_v57 = vsel %vm600_vm7, %v837_v43, %v800_v58 }
 0x36c   :  { %856 = vmatpush.bf16.msrb.mxu0 %v839_v20  ;;  %869 = vmatpush.bf16.msrb.mxu1 %v842_v57 }
 0x370   :  { %v719_v41 = vpop.permute.xlu0 %718 }
 0x371   :  { %v721_v42 = vpop.permute.xlu1 %720 }
 0x372   :  { %v724_v27 = vsel %vm2014_vm10, %v719_v41, %v721_v42  ;;  %v725_v59 = vsel %vm2015_vm14, %v721_v42, %v723_v63 }
 0x373   :  { %v814_v33 = vsel %vm2016_vm5, %v696_v3, %v724_v27  ;;  %v817_v0 = vsel %vm2001_vm4, %v697_v34, %v725_v59 }
 0x378   :  { %v733_v13 = vpop.permute.xlu0 %732 }
 0x379   :  { %v735_v26 = vpop.permute.xlu1 %734 }
 0x37a   :  { %v738_v28 = vsel %vm507_vm11, %v733_v13, %v735_v26  ;;  %v739_v29 = vsel %vm507_vm11, %v735_v26, %v737_v46 }
 0x37b   :  { %v819_v18 = vsel %vm595_vm12, %v814_v33, %v738_v28  ;;  %v821_v12 = vsel %vm595_vm12, %v817_v0, %v739_v29 }
 0x380   :  { %v747_v36 = vpop.permute.xlu0 %746 }
 0x381   :  { %v749_v11 = vpop.permute.xlu1 %748 }
 0x382   :  { %v752_v32 = vsel %vm522_vm3, %v747_v36, %v749_v11  ;;  %v753_v60 = vsel %vm522_vm3, %v749_v11, %v751_v30 }
 0x383   :  { %v823_v53 = vsel %vm600_vm7, %v819_v18, %v752_v32  ;;  %v826_v45 = vsel %vm600_vm7, %v821_v12, %v753_v60 }
 0x384   :  { %857 = vmatpush.bf16.msrb.mxu0 %v823_v53  ;;  %870 = vmatpush.bf16.msrb.mxu1 %v826_v45 }
 0x387   :  { %939 = vmatmul.msk.bf16.vlgmr.msrb.gmra.mxu0 %vm2017_vm0, %v269_v14  ;;  %940 = vmatmul.msk.bf16.vlgmr.msrb.gmra.mxu1 %vm2018_vm15, %v269_v14 }
 0x3ab   :  { %v200_v44 = vpop.xlane.xlu0 %199 }
 0x3ac   :  { %v201_v35 = vrot.slane %v200_v44, 4 }
 0x3ae   :  { %v202_v37 = vadd.f32 %v201_v35, %v200_v44 }
 0x3af   :  { %v664_v7 = vpop.permute.xlu1 %663 }
 0x3b0   :  { %v203_v48 = vrot.slane %v202_v37, 2 }
 0x3b2   :  { %v204_v47 = vadd.f32 %v203_v48, %v202_v37 }
 0x3b4   :  { %v205_v38 = vrot.slane %v204_v47, 1 }
 0x3b6   :  { %v206_v49 = vadd.f32 %v205_v38, %v204_v47 }
 0x3b8   :  { %949 = vpush %v206_v49 }
 0x3d6   :  { %v641_v52 = vpop.f32.mrf.mxu2 }
 0x3de   :  { %v654_v54 = vpop.f32.mrf.mxu3  ;;  %v643_v56 = vpop.f32.mrf.mxu2 }
 0x3e6   :  { %v656_v39 = vpop.f32.mrf.mxu3 }
 0x3e9   :  { %s950_s17 = spop %949 }
 0x3ea   :  { %v208_v55 = vstv %s950_s17 }
 0x3eb   :  { %986 = vrcp.f32 %v208_v55  ;;  %v220_v2 = vand.u32 2147483648, %v208_v55  ;;  %v218_v4 = vand.u32 2147483647, %v208_v55  ;;  %vm214_vm7 = vweird.f32 %v208_v55 }
 0x3ed   :  { %v221_v24 = vor.u32 1.1754944e-38, %v220_v2  ;;  %vm219_vm2 = vcmp.eq.f32.partialorder %v218_v4, 8.507059e+37 }
 0x3f1   :  { %v987_v61 = vpop.eup %986 }
 0x3f2   :  { %v210_v1 = vmul.f32 %v987_v61, %v208_v55  ;;  %vm215_vm12 = vweird.f32 %v987_v61 }
 0x3f3   :  { %vm216_vm13 = vmor %vm214_vm7, %vm215_vm12 }
 0x3f4   :  { %v211_v25 = vsub.f32 1.0, %v210_v1 }
 0x3f6   :  { %v212_v5 = vmul.f32 %v987_v61, %v211_v25 }
 0x3f8   :  { %v213_v8 = vadd.f32 %v987_v61, %v212_v5 }
 0x3fa   :  { %v217_v9 = vsel %vm216_vm13, %v987_v61, %v213_v8 }
 0x3fb   :  { %v222_v10 = vsel %vm219_vm2, %v221_v24, %v217_v9 }
 0x3fc   :  { %951 = vpush %v222_v10 }
 0x404   :  { %v859_v16 = vpop.f32.mrf.mxu0  ;;  %v872_v17 = vpop.f32.mrf.mxu1 }
 0x40c   :  { %v861_v31 = vpop.f32.mrf.mxu0  ;;  %v874_v19 = vpop.f32.mrf.mxu1 }
 0x42d   :  { %s952_s6 = spop %951 }
 0x42e   :  { %v658_v22 = vstv %s952_s6 }
 0x42f   :  { %v659_v23 = vmul.f32 %v658_v22, %v641_v52  ;;  %v660_v6 = vmul.f32 %v658_v22, %v654_v54  ;;  %v876_v40 = vmul.f32 %v859_v16, %v658_v22  ;;  %v877_v43 = vmul.f32 %v872_v17, %v658_v22 }
 0x431   :  { %v666_v14 = vadd.f32 %v664_v7, %v659_v23  ;;  %v667_v51 = vadd.f32 %v664_v7, %v660_v6  ;;  %v878_v50 = vadd.f32 %v876_v40, %v664_v7  ;;  %v879_v15 = vadd.f32 %v877_v43, %v664_v7 }
 0x433   :  { %668 = vst [vmem:[#allocation7] sm:$0xff] %v666_v14 }
 0x434   :  { %669 = vst [vmem:[#allocation7 + $0x8] sm:$0xff] %v667_v51 }
 0x435   :  { %881 = vst [vmem:[#allocation7 + $0x10] sm:$0xff] %v878_v50 }
 0x436   :  { %882 = vst [vmem:[#allocation7 + $0x18] sm:$0xff] %v879_v15 }
 0x437   :  { %895 = dma.vmem_to_hbm [thread:$0]  %s888_s22, 512, %s890_s19, [#allocation4], %s1138_s23, %s1138_s23, %s1126_s21  }
 0x438   :  { %1112 = dma.done.wait [#allocation4], 512  }
 0x439   :  { %1113 = vsyncadd [#allocation4], 4294966784 }
 0x43a   :  { %1114 = dma.done.wait [#allocation9], 32  }
 0x43b   :  { %1115 = vsyncadd [#allocation9], 4294967264 }
 0x43c   :  { %930 = vsyncpa [#allocation3], 1 }
 0x43d   :  { %931 = vsyncpa [#allocation6], 1 }
 0x43e   :  { %932 = vsyncpa [#allocation4], 1 }
 0x43f   :  { %933 = vsyncpa [#allocation9], 1 }

</bundles_post_ra>
